<compile_context>
chip_gen: v7x
topology: tpu7x:2x2x1
jax: 0.10.0
libtpu: 0.0.40
codegen_flags: <defaults>
</compile_context>

<pallas_src>
import jax
import jax.numpy as jnp
from jax.experimental import pallas as pl
from jax.experimental.pallas import tpu as pltpu


def _leaky_relu(x, slope=0.2):
    return jnp.where(x >= 0, x, slope * x)


def _round_up(x, m):
    return (x + m - 1) // m * m


def _disc_mlp_kernel(x_ref, e_ref,
                     w1i_ref, w1e_ref, b1_ref,
                     w2_ref, b2_ref,
                     w3_ref, b3_ref,
                     w4_ref, b4_ref,
                     out_ref):
    # x_ref: (TB, D_img) bf16, e_ref: (TB, LABEL_DIM) bf16
    x = x_ref[...]
    e = e_ref[...]

    # Fused "concat" matmul: [x | e] @ w1 == x @ w1_img + e @ w1_emb
    h = (jnp.dot(x, w1i_ref[...], preferred_element_type=jnp.float32)
         + jnp.dot(e, w1e_ref[...], preferred_element_type=jnp.float32)
         + b1_ref[...])
    h = _leaky_relu(h)

    h = jnp.dot(h.astype(w2_ref.dtype), w2_ref[...],
                preferred_element_type=jnp.float32) + b2_ref[...]
    # Dropout(0.4) -> identity (eval mode)
    h = _leaky_relu(h)

    h = jnp.dot(h.astype(w3_ref.dtype), w3_ref[...],
                preferred_element_type=jnp.float32) + b3_ref[...]
    # Dropout(0.4) -> identity (eval mode)
    h = _leaky_relu(h)

    # w4 is zero-padded to 128 output lanes for a lane-dense unmasked store.
    out = jnp.dot(h.astype(w4_ref.dtype), w4_ref[...],
                  preferred_element_type=jnp.float32) + b4_ref[...]
    out_ref[...] = out.astype(out_ref.dtype)


@jax.jit
def discriminator_forward(img, labels, params):
    """img: (B, C, H, W) float32, labels: (B,) int32 -> (B, 1) float32."""
    B = img.shape[0]
    # Flatten NCHW -> (B, C*H*W), same element ordering as torch's .view(B, -1).
    img_flat = img.reshape(B, -1)
    d_img = img_flat.shape[1]

    # Embedding lookup (gather) — glue in plain JAX.
    emb = jnp.take(params["embedding"], labels, axis=0)          # (B, label_dim)
    label_dim = emb.shape[1]

    # ---- Batch tiling / padding --------------------------------------------
    # Sublane-aligned batch tile; full 128/256-row tiles once B is large.
    if B >= 256:
        TB = 256
    elif B >= 128:
        TB = 128
    else:
        TB = _round_up(B, 8)
    B_pad = _round_up(B, TB)
    n_tiles = B_pad // TB

    pad_rows = B_pad - B
    if pad_rows:
        img_flat = jnp.pad(img_flat, ((0, pad_rows), (0, 0)))
        emb = jnp.pad(emb, ((0, pad_rows), (0, 0)))

    # ---- Weight prep: split w1, bf16 cast, lane-dense head ------------------
    hidden = params["w1"].shape[1]
    w1_img = params["w1"][:d_img, :].astype(jnp.bfloat16)        # (D_img, H)
    w1_emb = params["w1"][d_img:, :].astype(jnp.bfloat16)        # (label_dim, H)
    w2 = params["w2"].astype(jnp.bfloat16)
    w3 = params["w3"].astype(jnp.bfloat16)
    OUT_PAD = 128
    w4 = jnp.pad(params["w4"], ((0, 0), (0, OUT_PAD - 1))).astype(jnp.bfloat16)
    b4 = jnp.pad(params["b4"], ((0, 0), (0, OUT_PAD - 1)))       # f32 (1, 128)
    b1, b2, b3 = params["b1"], params["b2"], params["b3"]        # f32 (1, H)

    x_bf16 = img_flat.astype(jnp.bfloat16)
    e_bf16 = emb.astype(jnp.bfloat16)

    def batch_spec(cols):
        return pl.BlockSpec((TB, cols), lambda i: (i, 0))

    def const_spec(shape):
        return pl.BlockSpec(shape, lambda i: tuple(0 for _ in shape))

    out = pl.pallas_call(
        _disc_mlp_kernel,
        out_shape=jax.ShapeDtypeStruct((B_pad, OUT_PAD), jnp.float32),
        grid=(n_tiles,),
        in_specs=[
            batch_spec(d_img),                # x
            batch_spec(label_dim),            # emb
            const_spec(w1_img.shape), const_spec(w1_emb.shape), const_spec(b1.shape),
            const_spec(w2.shape), const_spec(b2.shape),
            const_spec(w3.shape), const_spec(b3.shape),
            const_spec(w4.shape), const_spec(b4.shape),
        ],
        out_specs=batch_spec(OUT_PAD),
        compiler_params=pltpu.CompilerParams(
            dimension_semantics=("parallel",),
        ),
    )(x_bf16, e_bf16, w1_img, w1_emb, b1, w2, b2, w3, b3, w4, b4)

    # Strip batch padding and the lane padding of the 1-logit head.
    return out[:B, :1]


def init_params(key, *, n_classes, label_dim, channels, img_size, hidden=512):
    d_in = label_dim + channels * img_size * img_size
    ks = jax.random.split(key, 9)
    scale = 0.02
    return {
        "embedding": scale * jax.random.normal(ks[0], (n_classes, label_dim), jnp.float32),
        "w1": scale * jax.random.normal(ks[1], (d_in, hidden), jnp.float32),
        "b1": scale * jax.random.normal(ks[2], (1, hidden), jnp.float32),
        "w2": scale * jax.random.normal(ks[3], (hidden, hidden), jnp.float32),
        "b2": scale * jax.random.normal(ks[4], (1, hidden), jnp.float32),
        "w3": scale * jax.random.normal(ks[5], (hidden, hidden), jnp.float32),
        "b3": scale * jax.random.normal(ks[6], (1, hidden), jnp.float32),
        "w4": scale * jax.random.normal(ks[7], (hidden, 1), jnp.float32),
        "b4": scale * jax.random.normal(ks[8], (1, 1), jnp.float32),
    }


def _reference_forward(img, labels, params):
    """Pure-JAX f32 reference of the same forward (eval-mode dropout)."""
    B = img.shape[0]
    x = img.reshape(B, -1)
    emb = jnp.take(params["embedding"], labels, axis=0)
    h = jnp.concatenate([x, emb], axis=-1)
    h = _leaky_relu(h @ params["w1"] + params["b1"])
    h = _leaky_relu(h @ params["w2"] + params["b2"])
    h = _leaky_relu(h @ params["w3"] + params["b3"])
    return h @ params["w4"] + params["b4"]


if __name__ == "__main__":
    # Small, module-consistent shapes.
    B, C, H_IMG, N_CLASSES, LABEL_DIM = 2, 4, 16, 10, 32

    key = jax.random.PRNGKey(0)
    k_img, k_lbl, k_par = jax.random.split(key, 3)

    img = jax.random.normal(k_img, (B, C, H_IMG, H_IMG), jnp.float32)
    labels = jax.random.randint(k_lbl, (B,), 0, N_CLASSES, dtype=jnp.int32)
    params = init_params(k_par, n_classes=N_CLASSES, label_dim=LABEL_DIM,
                         channels=C, img_size=H_IMG)

    out = discriminator_forward(img, labels, params)
    out = jax.block_until_ready(out)

    ref = _reference_forward(img, labels, params)
    assert out.shape == (B, 1), out.shape
    # bf16 weights/activations with f32 accumulation -> relaxed tolerance.
    assert jnp.allclose(out, ref, atol=2e-2, rtol=2e-2), (out, ref)

    print("KERNEL_OK")
</pallas_src>

<mosaic_0001>
module attributes {stable_mosaic.version = 11 : i64} {
  func.func @_disc_mlp_kernel(%arg0: i32, %arg1: memref<8x1024xbf16, #tpu.memory_space<vmem>>, %arg2: memref<8x32xbf16, #tpu.memory_space<vmem>>, %arg3: memref<1024x512xbf16, #tpu.memory_space<vmem>>, %arg4: memref<32x512xbf16, #tpu.memory_space<vmem>>, %arg5: memref<1x512xf32, #tpu.memory_space<vmem>>, %arg6: memref<512x512xbf16, #tpu.memory_space<vmem>>, %arg7: memref<1x512xf32, #tpu.memory_space<vmem>>, %arg8: memref<512x512xbf16, #tpu.memory_space<vmem>>, %arg9: memref<1x512xf32, #tpu.memory_space<vmem>>, %arg10: memref<512x128xbf16, #tpu.memory_space<vmem>>, %arg11: memref<1x128xf32, #tpu.memory_space<vmem>>, %arg12: memref<8x128xf32, #tpu.memory_space<vmem>>) attributes {dimension_semantics = [#tpu.dimension_semantics<parallel>], iteration_bounds = array<i64: 1>, scalar_prefetch = 0 : i64, scratch_operands = 0 : i64, tpu.core_type = #tpu.core_type<tc>, window_params = [{transform_indices = @transform_0, window_bounds = array<i64: 8, 1024>}, {transform_indices = @transform_1, window_bounds = array<i64: 8, 32>}, {pipeline_mode = #tpu.pipeline_mode<synchronous>, transform_indices = @transform_2, window_bounds = array<i64: 1024, 512>}, {pipeline_mode = #tpu.pipeline_mode<synchronous>, transform_indices = @transform_3, window_bounds = array<i64: 32, 512>}, {pipeline_mode = #tpu.pipeline_mode<synchronous>, transform_indices = @transform_4, window_bounds = array<i64: 1, 512>}, {pipeline_mode = #tpu.pipeline_mode<synchronous>, transform_indices = @transform_5, window_bounds = array<i64: 512, 512>}, {pipeline_mode = #tpu.pipeline_mode<synchronous>, transform_indices = @transform_6, window_bounds = array<i64: 1, 512>}, {pipeline_mode = #tpu.pipeline_mode<synchronous>, transform_indices = @transform_7, window_bounds = array<i64: 512, 512>}, {pipeline_mode = #tpu.pipeline_mode<synchronous>, transform_indices = @transform_8, window_bounds = array<i64: 1, 512>}, {pipeline_mode = #tpu.pipeline_mode<synchronous>, transform_indices = @transform_9, window_bounds = array<i64: 512, 128>}, {pipeline_mode = #tpu.pipeline_mode<synchronous>, transform_indices = @transform_10, window_bounds = array<i64: 1, 128>}, {transform_indices = @transform_11, window_bounds = array<i64: 8, 128>}]} {
    %c0 = arith.constant 0 : index
    %c0_0 = arith.constant 0 : index
    %0 = vector.load %arg1[%c0, %c0_0] : memref<8x1024xbf16, #tpu.memory_space<vmem>>, vector<8x1024xbf16>
    %c0_1 = arith.constant 0 : index
    %c0_2 = arith.constant 0 : index
    %1 = vector.load %arg2[%c0_1, %c0_2] : memref<8x32xbf16, #tpu.memory_space<vmem>>, vector<8x32xbf16>
    %c0_3 = arith.constant 0 : index
    %c0_4 = arith.constant 0 : index
    %2 = vector.load %arg3[%c0_3, %c0_4] : memref<1024x512xbf16, #tpu.memory_space<vmem>>, vector<1024x512xbf16>
    %cst = arith.constant dense<0.000000e+00> : vector<8x512xf32>
    %3 = tpu.matmul %0, %2, %cst {dimension_numbers = #tpu.dot_dimension_numbers<[1], [0], [0], [1], [0, 0, 1, 1], [], []>} : vector<8x1024xbf16>, vector<1024x512xbf16>, vector<8x512xf32> -> vector<8x512xf32>
    %c0_5 = arith.constant 0 : index
    %c0_6 = arith.constant 0 : index
    %4 = vector.load %arg4[%c0_5, %c0_6] : memref<32x512xbf16, #tpu.memory_space<vmem>>, vector<32x512xbf16>
    %cst_7 = arith.constant dense<0.000000e+00> : vector<8x512xf32>
    %5 = tpu.matmul %1, %4, %cst_7 {dimension_numbers = #tpu.dot_dimension_numbers<[1], [0], [0], [1], [0, 0, 1, 1], [], []>} : vector<8x32xbf16>, vector<32x512xbf16>, vector<8x512xf32> -> vector<8x512xf32>
    %6 = arith.addf %3, %5 : vector<8x512xf32>
    %c0_8 = arith.constant 0 : index
    %c0_9 = arith.constant 0 : index
    %7 = vector.load %arg5[%c0_8, %c0_9] : memref<1x512xf32, #tpu.memory_space<vmem>>, vector<1x512xf32>
    %8 = vector.broadcast %7 : vector<1x512xf32> to vector<8x512xf32>
    %9 = arith.addf %6, %8 : vector<8x512xf32>
    %cst_10 = arith.constant 0.000000e+00 : f32
    %10 = vector.broadcast %cst_10 : f32 to vector<8x512xf32>
    %11 = arith.cmpf oge, %9, %10 : vector<8x512xf32>
    %cst_11 = arith.constant 2.000000e-01 : f32
    %12 = vector.broadcast %cst_11 : f32 to vector<8x512xf32>
    %13 = arith.mulf %12, %9 : vector<8x512xf32>
    %14 = arith.select %11, %9, %13 : vector<8x512xi1>, vector<8x512xf32>
    %15 = arith.truncf %14 : vector<8x512xf32> to vector<8x512xbf16>
    %c0_12 = arith.constant 0 : index
    %c0_13 = arith.constant 0 : index
    %16 = vector.load %arg6[%c0_12, %c0_13] : memref<512x512xbf16, #tpu.memory_space<vmem>>, vector<512x512xbf16>
    %cst_14 = arith.constant dense<0.000000e+00> : vector<8x512xf32>
    %17 = tpu.matmul %15, %16, %cst_14 {dimension_numbers = #tpu.dot_dimension_numbers<[1], [0], [0], [1], [0, 0, 1, 1], [], []>} : vector<8x512xbf16>, vector<512x512xbf16>, vector<8x512xf32> -> vector<8x512xf32>
    %c0_15 = arith.constant 0 : index
    %c0_16 = arith.constant 0 : index
    %18 = vector.load %arg7[%c0_15, %c0_16] : memref<1x512xf32, #tpu.memory_space<vmem>>, vector<1x512xf32>
    %19 = vector.broadcast %18 : vector<1x512xf32> to vector<8x512xf32>
    %20 = arith.addf %17, %19 : vector<8x512xf32>
    %cst_17 = arith.constant 0.000000e+00 : f32
    %21 = vector.broadcast %cst_17 : f32 to vector<8x512xf32>
    %22 = arith.cmpf oge, %20, %21 : vector<8x512xf32>
    %cst_18 = arith.constant 2.000000e-01 : f32
    %23 = vector.broadcast %cst_18 : f32 to vector<8x512xf32>
    %24 = arith.mulf %23, %20 : vector<8x512xf32>
    %25 = arith.select %22, %20, %24 : vector<8x512xi1>, vector<8x512xf32>
    %26 = arith.truncf %25 : vector<8x512xf32> to vector<8x512xbf16>
    %c0_19 = arith.constant 0 : index
    %c0_20 = arith.constant 0 : index
    %27 = vector.load %arg8[%c0_19, %c0_20] : memref<512x512xbf16, #tpu.memory_space<vmem>>, vector<512x512xbf16>
    %cst_21 = arith.constant dense<0.000000e+00> : vector<8x512xf32>
    %28 = tpu.matmul %26, %27, %cst_21 {dimension_numbers = #tpu.dot_dimension_numbers<[1], [0], [0], [1], [0, 0, 1, 1], [], []>} : vector<8x512xbf16>, vector<512x512xbf16>, vector<8x512xf32> -> vector<8x512xf32>
    %c0_22 = arith.constant 0 : index
    %c0_23 = arith.constant 0 : index
    %29 = vector.load %arg9[%c0_22, %c0_23] : memref<1x512xf32, #tpu.memory_space<vmem>>, vector<1x512xf32>
    %30 = vector.broadcast %29 : vector<1x512xf32> to vector<8x512xf32>
    %31 = arith.addf %28, %30 : vector<8x512xf32>
    %cst_24 = arith.constant 0.000000e+00 : f32
    %32 = vector.broadcast %cst_24 : f32 to vector<8x512xf32>
    %33 = arith.cmpf oge, %31, %32 : vector<8x512xf32>
    %cst_25 = arith.constant 2.000000e-01 : f32
    %34 = vector.broadcast %cst_25 : f32 to vector<8x512xf32>
    %35 = arith.mulf %34, %31 : vector<8x512xf32>
    %36 = arith.select %33, %31, %35 : vector<8x512xi1>, vector<8x512xf32>
    %37 = arith.truncf %36 : vector<8x512xf32> to vector<8x512xbf16>
    %c0_26 = arith.constant 0 : index
    %c0_27 = arith.constant 0 : index
    %38 = vector.load %arg10[%c0_26, %c0_27] : memref<512x128xbf16, #tpu.memory_space<vmem>>, vector<512x128xbf16>
    %cst_28 = arith.constant dense<0.000000e+00> : vector<8x128xf32>
    %39 = tpu.matmul %37, %38, %cst_28 {dimension_numbers = #tpu.dot_dimension_numbers<[1], [0], [0], [1], [0, 0, 1, 1], [], []>} : vector<8x512xbf16>, vector<512x128xbf16>, vector<8x128xf32> -> vector<8x128xf32>
    %c0_29 = arith.constant 0 : index
    %c0_30 = arith.constant 0 : index
    %40 = vector.load %arg11[%c0_29, %c0_30] : memref<1x128xf32, #tpu.memory_space<vmem>>, vector<1x128xf32>
    %41 = vector.broadcast %40 : vector<1x128xf32> to vector<8x128xf32>
    %42 = arith.addf %39, %41 : vector<8x128xf32>
    %c0_31 = arith.constant 0 : index
    %c0_32 = arith.constant 0 : index
    %43 = vector.load %arg12[%c0_31, %c0_32] : memref<8x128xf32, #tpu.memory_space<vmem>>, vector<8x128xf32>
    tpu.vector_store %arg12[%c0_31, %c0_32], %42 {strides = array<i32>} : memref<8x128xf32, #tpu.memory_space<vmem>>, vector<8x128xf32>,
    return
  }
  func.func @transform_0(%arg0: i32) -> (i32, i32) {
    %c0_i32 = arith.constant 0 : i32
    %c0_i32_0 = arith.constant 0 : i32
    return %arg0, %c0_i32 : i32, i32
  }
  func.func @transform_1(%arg0: i32) -> (i32, i32) {
    %c0_i32 = arith.constant 0 : i32
    %c0_i32_0 = arith.constant 0 : i32
    return %arg0, %c0_i32 : i32, i32
  }
  func.func @transform_2(%arg0: i32) -> (i32, i32) {
    %c0_i32 = arith.constant 0 : i32
    %c0_i32_0 = arith.constant 0 : i32
    %c0_i32_1 = arith.constant 0 : i32
    return %c0_i32, %c0_i32_0 : i32, i32
  }
  func.func @transform_3(%arg0: i32) -> (i32, i32) {
    %c0_i32 = arith.constant 0 : i32
    %c0_i32_0 = arith.constant 0 : i32
    %c0_i32_1 = arith.constant 0 : i32
    return %c0_i32, %c0_i32_0 : i32, i32
  }
  func.func @transform_4(%arg0: i32) -> (i32, i32) {
    %c0_i32 = arith.constant 0 : i32
    %c0_i32_0 = arith.constant 0 : i32
    %c0_i32_1 = arith.constant 0 : i32
    return %c0_i32, %c0_i32_0 : i32, i32
  }
  func.func @transform_5(%arg0: i32) -> (i32, i32) {
    %c0_i32 = arith.constant 0 : i32
    %c0_i32_0 = arith.constant 0 : i32
    %c0_i32_1 = arith.constant 0 : i32
    return %c0_i32, %c0_i32_0 : i32, i32
  }
  func.func @transform_6(%arg0: i32) -> (i32, i32) {
    %c0_i32 = arith.constant 0 : i32
    %c0_i32_0 = arith.constant 0 : i32
    %c0_i32_1 = arith.constant 0 : i32
    return %c0_i32, %c0_i32_0 : i32, i32
  }
  func.func @transform_7(%arg0: i32) -> (i32, i32) {
    %c0_i32 = arith.constant 0 : i32
    %c0_i32_0 = arith.constant 0 : i32
    %c0_i32_1 = arith.constant 0 : i32
    return %c0_i32, %c0_i32_0 : i32, i32
  }
  func.func @transform_8(%arg0: i32) -> (i32, i32) {
    %c0_i32 = arith.constant 0 : i32
    %c0_i32_0 = arith.constant 0 : i32
    %c0_i32_1 = arith.constant 0 : i32
    return %c0_i32, %c0_i32_0 : i32, i32
  }
  func.func @transform_9(%arg0: i32) -> (i32, i32) {
    %c0_i32 = arith.constant 0 : i32
    %c0_i32_0 = arith.constant 0 : i32
    %c0_i32_1 = arith.constant 0 : i32
    return %c0_i32, %c0_i32_0 : i32, i32
  }
  func.func @transform_10(%arg0: i32) -> (i32, i32) {
    %c0_i32 = arith.constant 0 : i32
    %c0_i32_0 = arith.constant 0 : i32
    %c0_i32_1 = arith.constant 0 : i32
    return %c0_i32, %c0_i32_0 : i32, i32
  }
  func.func @transform_11(%arg0: i32) -> (i32, i32) {
    %c0_i32 = arith.constant 0 : i32
    %c0_i32_0 = arith.constant 0 : i32
    return %arg0, %c0_i32 : i32, i32
  }
}

</mosaic_0001>

<bundles_post_ra>
// kernel: discriminator_forward.1
= control target key start
LH: loop header
LB: loop body
LE: loop exit
PB: predicated region body
PF: predicated region fallthrough
CT: control target
= control target key end

     0   :  { %v5852_v1 = vmov 0   ;;  %vm348_vm0 = vcmask 261120   ;;  %s7702_s3 = inlined_call_operand.vmem [shape: bf16[32,512], index: 3, kind: input, shape index: {}]   ;;  %s7703_s1 = inlined_call_operand.vmem [shape: bf16[8,32], index: 1, kind: input, shape index: {}]   ;;  %s7704_s2 = inlined_call_operand.vmem [shape: bf16[1024,512], index: 2, kind: input, shape index: {}]   ;;  %s7705_s0 = inlined_call_operand.vmem [shape: bf16[8,1024], index: 0, kind: input, shape index: {}]   ;;  %s7706_s5 = inlined_call_operand.vmem [shape: bf16[512,512], index: 5, kind: input, shape index: {}]   ;;  %s7707_s4 = inlined_call_operand.vmem [shape: f32[1,512], index: 4, kind: input, shape index: {}]   ;;  %s7708_s7 = inlined_call_operand.vmem [shape: bf16[512,512], index: 7, kind: input, shape index: {}]   ;;  %s7709_s9 = inlined_call_operand.vmem [shape: bf16[512,128], index: 9, kind: input, shape index: {}]   ;;  %s7710_s6 = inlined_call_operand.vmem [shape: f32[1,512], index: 6, kind: input, shape index: {}]   ;;  %s7711_s8 = inlined_call_operand.vmem [shape: f32[1,512], index: 8, kind: input, shape index: {}]   ;;  %s7712_s10 = inlined_call_operand.vmem [shape: f32[1,128], index: 10, kind: input, shape index: {}]   ;;  %s7713_s11 = inlined_call_operand.vmem [shape: f32[8,128], index: 11, kind: output, shape index: {}]  }
   0x1   :  { %v5032_v0 = vld [vmem:[%s7702_s3 + $0x4] ss:$16 sps:$4 sm:$0xff]   ;;  %384 = vmatprep.mubr.bf16.mxu0 %v5852_v1  ;;  %425 = vmatprep.mubr.bf16.mxu1 %v5852_v1  ;;  %v5034_v2 = vld [vmem:[%s7702_s3 + $0xc] ss:$16 sps:$4 sm:$0xff]   ;;  %v5036_v3 = vld [vmem:[%s7702_s3] ss:$16 sps:$4 sm:$0xff]  }
   0x2   :  { %352 = vmatprep.subr.bf16.mxu0 %v5032_v0  ;;  %v5037_v4 = vld [vmem:[%s7702_s3 + $0x8] ss:$16 sps:$4 sm:$0xff]   ;;  %393 = vmatprep.subr.bf16.mxu1 %v5034_v2  ;;  %v5038_v5 = vld [vmem:[%s7702_s3 + $0x24] ss:$16 sps:$4 sm:$0xff]   ;;  %v5040_v6 = vld [vmem:[%s7702_s3 + $0x2c] ss:$16 sps:$4 sm:$0xff]  }
   0x3   :  { %353 = vmatpush1.bf16.msra.mxu0 %v5036_v3  ;;  %394 = vmatpush1.bf16.msra.mxu1 %v5037_v4  ;;  %v5042_v7 = vld [vmem:[%s7702_s3 + $0x20] ss:$16 sps:$4 sm:$0xff]   ;;  %v5043_v8 = vld [vmem:[%s7702_s3 + $0x28] ss:$16 sps:$4 sm:$0xff]   ;;  %v5046_v11 = vld [vmem:[%s7704_s2 + $0x4] ss:$16 sps:$4 sm:$0xff]  }
   0x4   :  { %354 = vmatprep.subr.bf16.mxu0 %v5038_v5  ;;  %395 = vmatprep.subr.bf16.mxu1 %v5040_v6  ;;  %v43_v9 = vld [vmem:[%s7703_s1] sm:$0xf]  ;;  %v5049_v13 = vld [vmem:[%s7704_s2 + $0x204] ss:$16 sps:$4 sm:$0xff]   ;;  %v40_v56 = vld [vmem:[%s7705_s0 + $0x8] sm:$0xff] }
   0x5   :  { %v5044_v10 = vld [vmem:[%s7704_s2] ss:$16 sps:$4 sm:$0xff]   ;;  %v5052_v14 = vld [vmem:[%s7704_s2 + $0x24] ss:$16 sps:$4 sm:$0xff]   ;;  %v6086_v59 = vcombine.high %v40_v56, %v40_v56 }
   0x6   :  { %v5047_v12 = vld [vmem:[%s7704_s2 + $0x200] ss:$16 sps:$4 sm:$0xff]   ;;  %v5055_v15 = vld [vmem:[%s7704_s2 + $0x224] ss:$16 sps:$4 sm:$0xff]  }
   0x7   :  { %355 = vmatpush1.bf16.msra.mxu0 %v5042_v7  ;;  %396 = vmatpush1.bf16.msra.mxu1 %v5043_v8  ;;  %v5050_v16 = vld [vmem:[%s7704_s2 + $0x20] ss:$16 sps:$4 sm:$0xff]   ;;  %v5058_v18 = vld [vmem:[%s7704_s2 + $0x44] ss:$16 sps:$4 sm:$0xff]  }
   0x8   :  { %1742 = vmatprep.subr.bf16.mxu0 %v5046_v11  ;;  %1783 = vmatprep.subr.bf16.mxu1 %v5049_v13  ;;  %v5053_v17 = vld [vmem:[%s7704_s2 + $0x220] ss:$16 sps:$4 sm:$0xff]   ;;  %v5061_v19 = vld [vmem:[%s7704_s2 + $0x244] ss:$16 sps:$4 sm:$0xff]  }
   0x9   :  { %v5056_v20 = vld [vmem:[%s7704_s2 + $0x40] ss:$16 sps:$4 sm:$0xff]   ;;  %v5064_v22 = vld [vmem:[%s7704_s2 + $0x64] ss:$16 sps:$4 sm:$0xff]  }
   0xa   :  { %4408 = vmatmul.mubr.msk.bf16.vlgmr.msra.gmra.mrb[0].mxu0 %vm348_vm0, %v43_v9  ;;  %4409 = vmatmul.mubr.msk.bf16.vlgmr.msra.gmra.mrb[0].mxu1 %vm348_vm0, %v43_v9  ;;  %v5059_v21 = vld [vmem:[%s7704_s2 + $0x240] ss:$16 sps:$4 sm:$0xff]   ;;  %v5067_v23 = vld [vmem:[%s7704_s2 + $0x264] ss:$16 sps:$4 sm:$0xff]  }
   0xb   :  { %1743 = vmatpush1.bf16.msra.mxu0 %v5044_v10  ;;  %1784 = vmatpush1.bf16.msra.mxu1 %v5047_v12  ;;  %v5062_v24 = vld [vmem:[%s7704_s2 + $0x60] ss:$16 sps:$4 sm:$0xff]   ;;  %v5070_v26 = vld [vmem:[%s7704_s2 + $0x84] ss:$16 sps:$4 sm:$0xff]  }
   0xc   :  { %1744 = vmatprep.subr.bf16.mxu0 %v5052_v14  ;;  %1785 = vmatprep.subr.bf16.mxu1 %v5055_v15  ;;  %v5065_v25 = vld [vmem:[%s7704_s2 + $0x260] ss:$16 sps:$4 sm:$0xff]   ;;  %v5073_v27 = vld [vmem:[%s7704_s2 + $0x284] ss:$16 sps:$4 sm:$0xff]  }
   0xd   :  { %v5068_v28 = vld [vmem:[%s7704_s2 + $0x80] ss:$16 sps:$4 sm:$0xff]   ;;  %v5076_v30 = vld [vmem:[%s7704_s2 + $0xa4] ss:$16 sps:$4 sm:$0xff]   ;;  %1815 = vmatprep.mubr.bf16.mxu1 %v6086_v59 }
   0xe   :  { %v5071_v29 = vld [vmem:[%s7704_s2 + $0x280] ss:$16 sps:$4 sm:$0xff]   ;;  %v5079_v31 = vld [vmem:[%s7704_s2 + $0x2a4] ss:$16 sps:$4 sm:$0xff]  }
   0xf   :  { %1745 = vmatpush1.bf16.msra.mxu0 %v5050_v16  ;;  %1786 = vmatpush1.bf16.msra.mxu1 %v5053_v17  ;;  %v5074_v32 = vld [vmem:[%s7704_s2 + $0xa0] ss:$16 sps:$4 sm:$0xff]   ;;  %v5082_v34 = vld [vmem:[%s7704_s2 + $0xc4] ss:$16 sps:$4 sm:$0xff]   ;;  %v6152_v17 = vcombine.low %v40_v56, %v40_v56 }
  0x10   :  { %1746 = vmatprep.subr.bf16.mxu0 %v5058_v18  ;;  %1787 = vmatprep.subr.bf16.mxu1 %v5061_v19  ;;  %v5077_v33 = vld [vmem:[%s7704_s2 + $0x2a0] ss:$16 sps:$4 sm:$0xff]   ;;  %v5085_v35 = vld [vmem:[%s7704_s2 + $0x2c4] ss:$16 sps:$4 sm:$0xff]  }
  0x11   :  { %v5080_v36 = vld [vmem:[%s7704_s2 + $0xc0] ss:$16 sps:$4 sm:$0xff]   ;;  %v5088_v38 = vld [vmem:[%s7704_s2 + $0xe4] ss:$16 sps:$4 sm:$0xff]  }
  0x12   :  { %v5083_v37 = vld [vmem:[%s7704_s2 + $0x2c0] ss:$16 sps:$4 sm:$0xff]   ;;  %v5091_v39 = vld [vmem:[%s7704_s2 + $0x2e4] ss:$16 sps:$4 sm:$0xff]  }
  0x13   :  { %1747 = vmatpush1.bf16.msra.mxu0 %v5056_v20  ;;  %1788 = vmatpush1.bf16.msra.mxu1 %v5059_v21  ;;  %v5086_v40 = vld [vmem:[%s7704_s2 + $0xe0] ss:$16 sps:$4 sm:$0xff]   ;;  %v5094_v42 = vld [vmem:[%s7704_s2 + $0x104] ss:$16 sps:$4 sm:$0xff]  }
  0x14   :  { %1748 = vmatprep.subr.bf16.mxu0 %v5064_v22  ;;  %1789 = vmatprep.subr.bf16.mxu1 %v5067_v23  ;;  %v5089_v41 = vld [vmem:[%s7704_s2 + $0x2e0] ss:$16 sps:$4 sm:$0xff]   ;;  %v5097_v43 = vld [vmem:[%s7704_s2 + $0x304] ss:$16 sps:$4 sm:$0xff]  }
  0x15   :  { %v5092_v44 = vld [vmem:[%s7704_s2 + $0x100] ss:$16 sps:$4 sm:$0xff]   ;;  %v5100_v46 = vld [vmem:[%s7704_s2 + $0x124] ss:$16 sps:$4 sm:$0xff]  }
  0x16   :  { %v5095_v45 = vld [vmem:[%s7704_s2 + $0x300] ss:$16 sps:$4 sm:$0xff]   ;;  %v5103_v47 = vld [vmem:[%s7704_s2 + $0x324] ss:$16 sps:$4 sm:$0xff]  }
  0x17   :  { %1749 = vmatpush1.bf16.msra.mxu0 %v5062_v24  ;;  %1790 = vmatpush1.bf16.msra.mxu1 %v5065_v25  ;;  %v5098_v48 = vld [vmem:[%s7704_s2 + $0x120] ss:$16 sps:$4 sm:$0xff]   ;;  %v5106_v50 = vld [vmem:[%s7704_s2 + $0x144] ss:$16 sps:$4 sm:$0xff]  }
  0x18   :  { %1750 = vmatprep.subr.bf16.mxu0 %v5070_v26  ;;  %1791 = vmatprep.subr.bf16.mxu1 %v5073_v27  ;;  %v5101_v49 = vld [vmem:[%s7704_s2 + $0x320] ss:$16 sps:$4 sm:$0xff]   ;;  %v5109_v51 = vld [vmem:[%s7704_s2 + $0x344] ss:$16 sps:$4 sm:$0xff]  }
  0x19   :  { %v5104_v52 = vld [vmem:[%s7704_s2 + $0x140] ss:$16 sps:$4 sm:$0xff]   ;;  %v5112_v54 = vld [vmem:[%s7704_s2 + $0x164] ss:$16 sps:$4 sm:$0xff]  }
  0x1a   :  { %v5107_v53 = vld [vmem:[%s7704_s2 + $0x340] ss:$16 sps:$4 sm:$0xff]   ;;  %v5115_v57 = vld [vmem:[%s7704_s2 + $0x364] ss:$16 sps:$4 sm:$0xff]  }
  0x1b   :  { %1751 = vmatpush1.bf16.msra.mxu0 %v5068_v28  ;;  %1792 = vmatpush1.bf16.msra.mxu1 %v5071_v29  ;;  %v39_v55 = vld [vmem:[%s7705_s0] sm:$0xff] }
  0x1c   :  { %1752 = vmatprep.subr.bf16.mxu0 %v5076_v30  ;;  %1793 = vmatprep.subr.bf16.mxu1 %v5079_v31  ;;  %v6084_v58 = vcombine.high %v39_v55, %v39_v55  ;;  %v5110_v60 = vld [vmem:[%s7704_s2 + $0x160] ss:$16 sps:$4 sm:$0xff]   ;;  %v5118_v62 = vld [vmem:[%s7704_s2 + $0x184] ss:$16 sps:$4 sm:$0xff]   ;;  %v6150_v16 = vcombine.low %v39_v55, %v39_v55 }
  0x1d   :  { %v5113_v61 = vld [vmem:[%s7704_s2 + $0x360] ss:$16 sps:$4 sm:$0xff]   ;;  %v5121_v63 = vld [vmem:[%s7704_s2 + $0x384] ss:$16 sps:$4 sm:$0xff]  }
  0x1e   :  { %1774 = vmatprep.mubr.bf16.mxu0 %v6084_v58  ;;  %v5116_v0 = vld [vmem:[%s7704_s2 + $0x180] ss:$16 sps:$4 sm:$0xff]   ;;  %v5124_v2 = vld [vmem:[%s7704_s2 + $0x1a4] ss:$16 sps:$4 sm:$0xff]  }
  0x1f   :  { %1753 = vmatpush1.bf16.msra.mxu0 %v5074_v32  ;;  %1794 = vmatpush1.bf16.msra.mxu1 %v5077_v33  ;;  %v5119_v1 = vld [vmem:[%s7704_s2 + $0x380] ss:$16 sps:$4 sm:$0xff]   ;;  %v5127_v3 = vld [vmem:[%s7704_s2 + $0x3a4] ss:$16 sps:$4 sm:$0xff]  }
  0x20   :  { %1754 = vmatprep.subr.bf16.mxu0 %v5082_v34  ;;  %1795 = vmatprep.subr.bf16.mxu1 %v5085_v35  ;;  %v5122_v4 = vld [vmem:[%s7704_s2 + $0x1a0] ss:$16 sps:$4 sm:$0xff]   ;;  %v5130_v6 = vld [vmem:[%s7704_s2 + $0x1c4] ss:$16 sps:$4 sm:$0xff]  }
  0x21   :  { %v5125_v5 = vld [vmem:[%s7704_s2 + $0x3a0] ss:$16 sps:$4 sm:$0xff]   ;;  %v5133_v7 = vld [vmem:[%s7704_s2 + $0x3c4] ss:$16 sps:$4 sm:$0xff]  }
  0x22   :  { %v5128_v8 = vld [vmem:[%s7704_s2 + $0x1c0] ss:$16 sps:$4 sm:$0xff]   ;;  %v5136_v10 = vld [vmem:[%s7704_s2 + $0x1e4] ss:$16 sps:$4 sm:$0xff]  }
  0x23   :  { %1755 = vmatpush1.bf16.msra.mxu0 %v5080_v36  ;;  %1796 = vmatpush1.bf16.msra.mxu1 %v5083_v37  ;;  %v5131_v9 = vld [vmem:[%s7704_s2 + $0x3c0] ss:$16 sps:$4 sm:$0xff]   ;;  %v5139_v11 = vld [vmem:[%s7704_s2 + $0x3e4] ss:$16 sps:$4 sm:$0xff]  }
  0x24   :  { %1756 = vmatprep.subr.bf16.mxu0 %v5088_v38  ;;  %1797 = vmatprep.subr.bf16.mxu1 %v5091_v39  ;;  %v5134_v12 = vld [vmem:[%s7704_s2 + $0x1e0] ss:$16 sps:$4 sm:$0xff]   ;;  %v5146_v14 = vld [vmem:[%s7704_s2 + $0x404] ss:$16 sps:$4 sm:$0xff]  }
  0x25   :  { %v5137_v13 = vld [vmem:[%s7704_s2 + $0x3e0] ss:$16 sps:$4 sm:$0xff]   ;;  %v5149_v15 = vld [vmem:[%s7704_s2 + $0x604] ss:$16 sps:$4 sm:$0xff]  }
  0x26   :  { %v5144_v18 = vld [vmem:[%s7704_s2 + $0x400] ss:$16 sps:$4 sm:$0xff]   ;;  %v5152_v20 = vld [vmem:[%s7704_s2 + $0x424] ss:$16 sps:$4 sm:$0xff]  }
  0x27   :  { %1757 = vmatpush1.bf16.msra.mxu0 %v5086_v40  ;;  %1798 = vmatpush1.bf16.msra.mxu1 %v5089_v41  ;;  %v5147_v19 = vld [vmem:[%s7704_s2 + $0x600] ss:$16 sps:$4 sm:$0xff]   ;;  %v5155_v21 = vld [vmem:[%s7704_s2 + $0x624] ss:$16 sps:$4 sm:$0xff]  }
  0x28   :  { %1758 = vmatprep.subr.bf16.mxu0 %v5094_v42  ;;  %1799 = vmatprep.subr.bf16.mxu1 %v5097_v43  ;;  %v5150_v22 = vld [vmem:[%s7704_s2 + $0x420] ss:$16 sps:$4 sm:$0xff]   ;;  %v5158_v24 = vld [vmem:[%s7704_s2 + $0x444] ss:$16 sps:$4 sm:$0xff]   ;;  %v6234_v42 = vld [vmem:[%s7705_s0 + $0x18] sm:$0xff] }
  0x29   :  { %v5153_v23 = vld [vmem:[%s7704_s2 + $0x620] ss:$16 sps:$4 sm:$0xff]   ;;  %v5161_v25 = vld [vmem:[%s7704_s2 + $0x644] ss:$16 sps:$4 sm:$0xff]  }
  0x2a   :  { %v5156_v26 = vld [vmem:[%s7704_s2 + $0x440] ss:$16 sps:$4 sm:$0xff]   ;;  %v5164_v28 = vld [vmem:[%s7704_s2 + $0x464] ss:$16 sps:$4 sm:$0xff]  }
  0x2b   :  { %1759 = vmatpush1.bf16.msra.mxu0 %v5092_v44  ;;  %1800 = vmatpush1.bf16.msra.mxu1 %v5095_v45  ;;  %v5159_v27 = vld [vmem:[%s7704_s2 + $0x640] ss:$16 sps:$4 sm:$0xff]   ;;  %v5167_v29 = vld [vmem:[%s7704_s2 + $0x664] ss:$16 sps:$4 sm:$0xff]   ;;  %v6244_v45 = vcombine.high %v6234_v42, %v6234_v42 }
  0x2c   :  { %1760 = vmatprep.subr.bf16.mxu0 %v5100_v46  ;;  %1801 = vmatprep.subr.bf16.mxu1 %v5103_v47  ;;  %v5162_v30 = vld [vmem:[%s7704_s2 + $0x460] ss:$16 sps:$4 sm:$0xff]   ;;  %v5170_v32 = vld [vmem:[%s7704_s2 + $0x484] ss:$16 sps:$4 sm:$0xff]  }
  0x2d   :  { %v5165_v31 = vld [vmem:[%s7704_s2 + $0x660] ss:$16 sps:$4 sm:$0xff]   ;;  %v5173_v33 = vld [vmem:[%s7704_s2 + $0x684] ss:$16 sps:$4 sm:$0xff]  }
  0x2e   :  { %v5168_v34 = vld [vmem:[%s7704_s2 + $0x480] ss:$16 sps:$4 sm:$0xff]   ;;  %v5176_v36 = vld [vmem:[%s7704_s2 + $0x4a4] ss:$16 sps:$4 sm:$0xff]  }
  0x2f   :  { %1761 = vmatpush1.bf16.msra.mxu0 %v5098_v48  ;;  %1802 = vmatpush1.bf16.msra.mxu1 %v5101_v49  ;;  %v5171_v35 = vld [vmem:[%s7704_s2 + $0x680] ss:$16 sps:$4 sm:$0xff]   ;;  %v5179_v37 = vld [vmem:[%s7704_s2 + $0x6a4] ss:$16 sps:$4 sm:$0xff]  }
  0x30   :  { %1762 = vmatprep.subr.bf16.mxu0 %v5106_v50  ;;  %1803 = vmatprep.subr.bf16.mxu1 %v5109_v51  ;;  %v5174_v38 = vld [vmem:[%s7704_s2 + $0x4a0] ss:$16 sps:$4 sm:$0xff]   ;;  %v5182_v43 = vld [vmem:[%s7704_s2 + $0x4c4] ss:$16 sps:$4 sm:$0xff]  }
  0x31   :  { %v5177_v39 = vld [vmem:[%s7704_s2 + $0x6a0] ss:$16 sps:$4 sm:$0xff]   ;;  %v5185_v44 = vld [vmem:[%s7704_s2 + $0x6c4] ss:$16 sps:$4 sm:$0xff]  }
  0x32   :  { %v6225_v40 = vld [vmem:[%s7705_s0 + $0x10] sm:$0xff] }
  0x33   :  { %1763 = vmatpush1.bf16.msra.mxu0 %v5104_v52  ;;  %1804 = vmatpush1.bf16.msra.mxu1 %v5107_v53  ;;  %v6229_v41 = vcombine.high %v6225_v40, %v6225_v40  ;;  %v5180_v46 = vld [vmem:[%s7704_s2 + $0x4c0] ss:$16 sps:$4 sm:$0xff]   ;;  %v5188_v48 = vld [vmem:[%s7704_s2 + $0x4e4] ss:$16 sps:$4 sm:$0xff]  }
  0x34   :  { %1764 = vmatprep.subr.bf16.mxu0 %v5112_v54  ;;  %1805 = vmatprep.subr.bf16.mxu1 %v5115_v57  ;;  %v5183_v47 = vld [vmem:[%s7704_s2 + $0x6c0] ss:$16 sps:$4 sm:$0xff]   ;;  %v5191_v49 = vld [vmem:[%s7704_s2 + $0x6e4] ss:$16 sps:$4 sm:$0xff]  }
  0x35   :  { %v5186_v50 = vld [vmem:[%s7704_s2 + $0x4e0] ss:$16 sps:$4 sm:$0xff]   ;;  %v5194_v52 = vld [vmem:[%s7704_s2 + $0x504] ss:$16 sps:$4 sm:$0xff]  }
  0x36   :  { %v5189_v51 = vld [vmem:[%s7704_s2 + $0x6e0] ss:$16 sps:$4 sm:$0xff]   ;;  %v5197_v53 = vld [vmem:[%s7704_s2 + $0x704] ss:$16 sps:$4 sm:$0xff]  }
  0x37   :  { %1765 = vmatpush1.bf16.msra.mxu0 %v5110_v60  ;;  %1806 = vmatpush1.bf16.msra.mxu1 %v5113_v61  ;;  %v5192_v54 = vld [vmem:[%s7704_s2 + $0x500] ss:$16 sps:$4 sm:$0xff]   ;;  %v5200_v56 = vld [vmem:[%s7704_s2 + $0x524] ss:$16 sps:$4 sm:$0xff]  }
  0x38   :  { %1766 = vmatprep.subr.bf16.mxu0 %v5118_v62  ;;  %1807 = vmatprep.subr.bf16.mxu1 %v5121_v63  ;;  %v5195_v55 = vld [vmem:[%s7704_s2 + $0x700] ss:$16 sps:$4 sm:$0xff]   ;;  %v5203_v57 = vld [vmem:[%s7704_s2 + $0x724] ss:$16 sps:$4 sm:$0xff]  }
  0x39   :  { %v5198_v60 = vld [vmem:[%s7704_s2 + $0x520] ss:$16 sps:$4 sm:$0xff]   ;;  %v5206_v62 = vld [vmem:[%s7704_s2 + $0x544] ss:$16 sps:$4 sm:$0xff]  }
  0x3a   :  { %v5201_v61 = vld [vmem:[%s7704_s2 + $0x720] ss:$16 sps:$4 sm:$0xff]   ;;  %v5209_v63 = vld [vmem:[%s7704_s2 + $0x744] ss:$16 sps:$4 sm:$0xff]  }
  0x3b   :  { %1767 = vmatpush1.bf16.msra.mxu0 %v5116_v0  ;;  %1808 = vmatpush1.bf16.msra.mxu1 %v5119_v1  ;;  %v5204_v0 = vld [vmem:[%s7704_s2 + $0x540] ss:$16 sps:$4 sm:$0xff]  }
  0x3c   :  { %1768 = vmatprep.subr.bf16.mxu0 %v5124_v2  ;;  %1809 = vmatprep.subr.bf16.mxu1 %v5127_v3  ;;  %v5207_v1 = vld [vmem:[%s7704_s2 + $0x740] ss:$16 sps:$4 sm:$0xff]   ;;  %v5212_v2 = vld [vmem:[%s7704_s2 + $0x564] ss:$16 sps:$4 sm:$0xff]  }
  0x3d   :  { %v5215_v3 = vld [vmem:[%s7704_s2 + $0x764] ss:$16 sps:$4 sm:$0xff]  }
  0x3f   :  { %1769 = vmatpush1.bf16.msra.mxu0 %v5122_v4  ;;  %1810 = vmatpush1.bf16.msra.mxu1 %v5125_v5  ;;  %v5210_v4 = vld [vmem:[%s7704_s2 + $0x560] ss:$16 sps:$4 sm:$0xff]  }
  0x40   :  { %1770 = vmatprep.subr.bf16.mxu0 %v5130_v6  ;;  %1811 = vmatprep.subr.bf16.mxu1 %v5133_v7  ;;  %v5213_v5 = vld [vmem:[%s7704_s2 + $0x760] ss:$16 sps:$4 sm:$0xff]   ;;  %v5218_v6 = vld [vmem:[%s7704_s2 + $0x584] ss:$16 sps:$4 sm:$0xff]  }
  0x41   :  { %v5221_v7 = vld [vmem:[%s7704_s2 + $0x784] ss:$16 sps:$4 sm:$0xff]  }
  0x43   :  { %1771 = vmatpush1.bf16.msra.mxu0 %v5128_v8  ;;  %1812 = vmatpush1.bf16.msra.mxu1 %v5131_v9  ;;  %v5216_v8 = vld [vmem:[%s7704_s2 + $0x580] ss:$16 sps:$4 sm:$0xff]  }
  0x44   :  { %1772 = vmatprep.subr.bf16.mxu0 %v5136_v10  ;;  %1813 = vmatprep.subr.bf16.mxu1 %v5139_v11  ;;  %v5219_v9 = vld [vmem:[%s7704_s2 + $0x780] ss:$16 sps:$4 sm:$0xff]   ;;  %v5224_v10 = vld [vmem:[%s7704_s2 + $0x5a4] ss:$16 sps:$4 sm:$0xff]  }
  0x45   :  { %v5227_v11 = vld [vmem:[%s7704_s2 + $0x7a4] ss:$16 sps:$4 sm:$0xff]  }
  0x47   :  { %1773 = vmatpush1.bf16.msra.mxu0 %v5134_v12  ;;  %1814 = vmatpush1.bf16.msra.mxu1 %v5137_v13  ;;  %v5222_v12 = vld [vmem:[%s7704_s2 + $0x5a0] ss:$16 sps:$4 sm:$0xff]  }
  0x48   :  { %1824 = vmatprep.subr.bf16.mxu0 %v5146_v14  ;;  %1865 = vmatprep.subr.bf16.mxu1 %v5149_v15  ;;  %v5225_v13 = vld [vmem:[%s7704_s2 + $0x7a0] ss:$16 sps:$4 sm:$0xff]   ;;  %v5230_v14 = vld [vmem:[%s7704_s2 + $0x5c4] ss:$16 sps:$4 sm:$0xff]  }
  0x49   :  { %v5233_v15 = vld [vmem:[%s7704_s2 + $0x7c4] ss:$16 sps:$4 sm:$0xff]  }
  0x4a   :  { %1775 = vmatmul.mubr.bf16.vlgmr.msra.gmra.mrb[4].mxu0 %v6150_v16  ;;  %1816 = vmatmul.mubr.bf16.vlgmr.msra.gmra.mrb[4].mxu1 %v6152_v17 }
  0x4b   :  { %1825 = vmatpush1.bf16.msra.mxu0 %v5144_v18  ;;  %1866 = vmatpush1.bf16.msra.mxu1 %v5147_v19  ;;  %v5228_v18 = vld [vmem:[%s7704_s2 + $0x5c0] ss:$16 sps:$4 sm:$0xff]  }
  0x4c   :  { %1826 = vmatprep.subr.bf16.mxu0 %v5152_v20  ;;  %1867 = vmatprep.subr.bf16.mxu1 %v5155_v21  ;;  %v5231_v19 = vld [vmem:[%s7704_s2 + $0x7c0] ss:$16 sps:$4 sm:$0xff]   ;;  %v5236_v20 = vld [vmem:[%s7704_s2 + $0x5e4] ss:$16 sps:$4 sm:$0xff]  }
  0x4d   :  { %1856 = vmatprep.mubr.bf16.mxu0 %v6229_v41  ;;  %1897 = vmatprep.mubr.bf16.mxu1 %v6244_v45  ;;  %v5239_v21 = vld [vmem:[%s7704_s2 + $0x7e4] ss:$16 sps:$4 sm:$0xff]  }
  0x4f   :  { %1827 = vmatpush1.bf16.msra.mxu0 %v5150_v22  ;;  %1868 = vmatpush1.bf16.msra.mxu1 %v5153_v23  ;;  %v5234_v22 = vld [vmem:[%s7704_s2 + $0x5e0] ss:$16 sps:$4 sm:$0xff]  }
  0x50   :  { %1828 = vmatprep.subr.bf16.mxu0 %v5158_v24  ;;  %1869 = vmatprep.subr.bf16.mxu1 %v5161_v25  ;;  %v5237_v23 = vld [vmem:[%s7704_s2 + $0x7e0] ss:$16 sps:$4 sm:$0xff]   ;;  %v5246_v24 = vld [vmem:[%s7704_s2 + $0xc] ss:$16 sps:$4 sm:$0xff]  }
  0x51   :  { %v5249_v25 = vld [vmem:[%s7704_s2 + $0x20c] ss:$16 sps:$4 sm:$0xff]  }
  0x53   :  { %1829 = vmatpush1.bf16.msra.mxu0 %v5156_v26  ;;  %1870 = vmatpush1.bf16.msra.mxu1 %v5159_v27  ;;  %v6370_v26 = vcombine.low %v6225_v40, %v6225_v40  ;;  %v6374_v27 = vcombine.low %v6234_v42, %v6234_v42  ;;  %v5270_v40 = vld [vmem:[%s7704_s2 + $0x8c] ss:$16 sps:$4 sm:$0xff]  }
  0x54   :  { %1830 = vmatprep.subr.bf16.mxu0 %v5164_v28  ;;  %1871 = vmatprep.subr.bf16.mxu1 %v5167_v29  ;;  %v5244_v28 = vld [vmem:[%s7704_s2 + $0x8] ss:$16 sps:$4 sm:$0xff]   ;;  %v5273_v42 = vld [vmem:[%s7704_s2 + $0x28c] ss:$16 sps:$4 sm:$0xff]  }
  0x55   :  { %v5247_v29 = vld [vmem:[%s7704_s2 + $0x208] ss:$16 sps:$4 sm:$0xff]  }
  0x57   :  { %1831 = vmatpush1.bf16.msra.mxu0 %v5162_v30  ;;  %1872 = vmatpush1.bf16.msra.mxu1 %v5165_v31  ;;  %v5252_v30 = vld [vmem:[%s7704_s2 + $0x2c] ss:$16 sps:$4 sm:$0xff]  }
  0x58   :  { %1832 = vmatprep.subr.bf16.mxu0 %v5170_v32  ;;  %1873 = vmatprep.subr.bf16.mxu1 %v5173_v33  ;;  %v5255_v31 = vld [vmem:[%s7704_s2 + $0x22c] ss:$16 sps:$4 sm:$0xff]   ;;  %v5250_v32 = vld [vmem:[%s7704_s2 + $0x28] ss:$16 sps:$4 sm:$0xff]  }
  0x59   :  { %v5253_v33 = vld [vmem:[%s7704_s2 + $0x228] ss:$16 sps:$4 sm:$0xff]  }
  0x5b   :  { %1833 = vmatpush1.bf16.msra.mxu0 %v5168_v34  ;;  %1874 = vmatpush1.bf16.msra.mxu1 %v5171_v35  ;;  %v5258_v34 = vld [vmem:[%s7704_s2 + $0x4c] ss:$16 sps:$4 sm:$0xff]  }
  0x5c   :  { %1834 = vmatprep.subr.bf16.mxu0 %v5176_v36  ;;  %1875 = vmatprep.subr.bf16.mxu1 %v5179_v37  ;;  %v5261_v35 = vld [vmem:[%s7704_s2 + $0x24c] ss:$16 sps:$4 sm:$0xff]   ;;  %v5256_v36 = vld [vmem:[%s7704_s2 + $0x48] ss:$16 sps:$4 sm:$0xff]  }
  0x5d   :  { %v5259_v37 = vld [vmem:[%s7704_s2 + $0x248] ss:$16 sps:$4 sm:$0xff]  }
  0x5f   :  { %1835 = vmatpush1.bf16.msra.mxu0 %v5174_v38  ;;  %1876 = vmatpush1.bf16.msra.mxu1 %v5177_v39  ;;  %v5264_v38 = vld [vmem:[%s7704_s2 + $0x6c] ss:$16 sps:$4 sm:$0xff]   ;;  %v5265_v39 = vld [vmem:[%s7704_s2 + $0x268] ss:$16 sps:$4 sm:$0xff]  }
  0x60   :  { %1836 = vmatprep.subr.bf16.mxu0 %v5182_v43  ;;  %1877 = vmatprep.subr.bf16.mxu1 %v5185_v44  ;;  %v5268_v43 = vld [vmem:[%s7704_s2 + $0x88] ss:$16 sps:$4 sm:$0xff]  }
  0x61   :  { %v5271_v44 = vld [vmem:[%s7704_s2 + $0x288] ss:$16 sps:$4 sm:$0xff]  }
  0x63   :  { %1837 = vmatpush1.bf16.msra.mxu0 %v5180_v46  ;;  %1878 = vmatpush1.bf16.msra.mxu1 %v5183_v47  ;;  %v5276_v46 = vld [vmem:[%s7704_s2 + $0xac] ss:$16 sps:$4 sm:$0xff]  }
  0x64   :  { %1838 = vmatprep.subr.bf16.mxu0 %v5188_v48  ;;  %1879 = vmatprep.subr.bf16.mxu1 %v5191_v49  ;;  %v5279_v47 = vld [vmem:[%s7704_s2 + $0x2ac] ss:$16 sps:$4 sm:$0xff]   ;;  %v5274_v48 = vld [vmem:[%s7704_s2 + $0xa8] ss:$16 sps:$4 sm:$0xff]  }
  0x65   :  { %v5277_v49 = vld [vmem:[%s7704_s2 + $0x2a8] ss:$16 sps:$4 sm:$0xff]  }
  0x67   :  { %1839 = vmatpush1.bf16.msra.mxu0 %v5186_v50  ;;  %1880 = vmatpush1.bf16.msra.mxu1 %v5189_v51  ;;  %v5282_v50 = vld [vmem:[%s7704_s2 + $0xcc] ss:$16 sps:$4 sm:$0xff]  }
  0x68   :  { %1840 = vmatprep.subr.bf16.mxu0 %v5194_v52  ;;  %1881 = vmatprep.subr.bf16.mxu1 %v5197_v53  ;;  %v5285_v51 = vld [vmem:[%s7704_s2 + $0x2cc] ss:$16 sps:$4 sm:$0xff]   ;;  %v5280_v52 = vld [vmem:[%s7704_s2 + $0xc8] ss:$16 sps:$4 sm:$0xff]  }
  0x69   :  { %v5283_v53 = vld [vmem:[%s7704_s2 + $0x2c8] ss:$16 sps:$4 sm:$0xff]  }
  0x6b   :  { %1841 = vmatpush1.bf16.msra.mxu0 %v5192_v54  ;;  %1882 = vmatpush1.bf16.msra.mxu1 %v5195_v55  ;;  %v5288_v54 = vld [vmem:[%s7704_s2 + $0xec] ss:$16 sps:$4 sm:$0xff]  }
  0x6c   :  { %1842 = vmatprep.subr.bf16.mxu0 %v5200_v56  ;;  %1883 = vmatprep.subr.bf16.mxu1 %v5203_v57  ;;  %v5291_v55 = vld [vmem:[%s7704_s2 + $0x2ec] ss:$16 sps:$4 sm:$0xff]   ;;  %v5286_v56 = vld [vmem:[%s7704_s2 + $0xe8] ss:$16 sps:$4 sm:$0xff]  }
  0x6d   :  { %v5289_v57 = vld [vmem:[%s7704_s2 + $0x2e8] ss:$16 sps:$4 sm:$0xff]  }
  0x6f   :  { %1843 = vmatpush1.bf16.msra.mxu0 %v5198_v60  ;;  %1884 = vmatpush1.bf16.msra.mxu1 %v5201_v61  ;;  %v5294_v60 = vld [vmem:[%s7704_s2 + $0x10c] ss:$16 sps:$4 sm:$0xff]  }
  0x70   :  { %1844 = vmatprep.subr.bf16.mxu0 %v5206_v62  ;;  %1885 = vmatprep.subr.bf16.mxu1 %v5209_v63  ;;  %v5297_v61 = vld [vmem:[%s7704_s2 + $0x30c] ss:$16 sps:$4 sm:$0xff]   ;;  %v5292_v62 = vld [vmem:[%s7704_s2 + $0x108] ss:$16 sps:$4 sm:$0xff]  }
  0x71   :  { %v5295_v63 = vld [vmem:[%s7704_s2 + $0x308] ss:$16 sps:$4 sm:$0xff]  }
  0x73   :  { %1845 = vmatpush1.bf16.msra.mxu0 %v5204_v0  ;;  %1886 = vmatpush1.bf16.msra.mxu1 %v5207_v1  ;;  %v5300_v0 = vld [vmem:[%s7704_s2 + $0x12c] ss:$16 sps:$4 sm:$0xff]  }
  0x74   :  { %1846 = vmatprep.subr.bf16.mxu0 %v5212_v2  ;;  %1887 = vmatprep.subr.bf16.mxu1 %v5215_v3  ;;  %v5303_v1 = vld [vmem:[%s7704_s2 + $0x32c] ss:$16 sps:$4 sm:$0xff]   ;;  %v5298_v2 = vld [vmem:[%s7704_s2 + $0x128] ss:$16 sps:$4 sm:$0xff]  }
  0x75   :  { %v5301_v3 = vld [vmem:[%s7704_s2 + $0x328] ss:$16 sps:$4 sm:$0xff]  }
  0x77   :  { %1847 = vmatpush1.bf16.msra.mxu0 %v5210_v4  ;;  %1888 = vmatpush1.bf16.msra.mxu1 %v5213_v5  ;;  %v5306_v4 = vld [vmem:[%s7704_s2 + $0x14c] ss:$16 sps:$4 sm:$0xff]  }
  0x78   :  { %1848 = vmatprep.subr.bf16.mxu0 %v5218_v6  ;;  %1889 = vmatprep.subr.bf16.mxu1 %v5221_v7  ;;  %v5309_v5 = vld [vmem:[%s7704_s2 + $0x34c] ss:$16 sps:$4 sm:$0xff]   ;;  %v5304_v6 = vld [vmem:[%s7704_s2 + $0x148] ss:$16 sps:$4 sm:$0xff]  }
  0x79   :  { %v5307_v7 = vld [vmem:[%s7704_s2 + $0x348] ss:$16 sps:$4 sm:$0xff]  }
  0x7b   :  { %1849 = vmatpush1.bf16.msra.mxu0 %v5216_v8  ;;  %1890 = vmatpush1.bf16.msra.mxu1 %v5219_v9  ;;  %v5312_v8 = vld [vmem:[%s7704_s2 + $0x16c] ss:$16 sps:$4 sm:$0xff]  }
  0x7c   :  { %1850 = vmatprep.subr.bf16.mxu0 %v5224_v10  ;;  %1891 = vmatprep.subr.bf16.mxu1 %v5227_v11  ;;  %v5315_v9 = vld [vmem:[%s7704_s2 + $0x36c] ss:$16 sps:$4 sm:$0xff]   ;;  %v5310_v10 = vld [vmem:[%s7704_s2 + $0x168] ss:$16 sps:$4 sm:$0xff]  }
  0x7d   :  { %v5313_v11 = vld [vmem:[%s7704_s2 + $0x368] ss:$16 sps:$4 sm:$0xff]  }
  0x7f   :  { %1851 = vmatpush1.bf16.msra.mxu0 %v5222_v12  ;;  %1892 = vmatpush1.bf16.msra.mxu1 %v5225_v13  ;;  %v5318_v12 = vld [vmem:[%s7704_s2 + $0x18c] ss:$16 sps:$4 sm:$0xff]  }
  0x80   :  { %1852 = vmatprep.subr.bf16.mxu0 %v5230_v14  ;;  %1893 = vmatprep.subr.bf16.mxu1 %v5233_v15  ;;  %v5321_v13 = vld [vmem:[%s7704_s2 + $0x38c] ss:$16 sps:$4 sm:$0xff]   ;;  %v5316_v14 = vld [vmem:[%s7704_s2 + $0x188] ss:$16 sps:$4 sm:$0xff]  }
  0x81   :  { %v5319_v15 = vld [vmem:[%s7704_s2 + $0x388] ss:$16 sps:$4 sm:$0xff]  }
  0x83   :  { %1853 = vmatpush1.bf16.msra.mxu0 %v5228_v18  ;;  %1894 = vmatpush1.bf16.msra.mxu1 %v5231_v19  ;;  %v5324_v18 = vld [vmem:[%s7704_s2 + $0x1ac] ss:$16 sps:$4 sm:$0xff]  }
  0x84   :  { %1854 = vmatprep.subr.bf16.mxu0 %v5236_v20  ;;  %1895 = vmatprep.subr.bf16.mxu1 %v5239_v21  ;;  %v5327_v19 = vld [vmem:[%s7704_s2 + $0x3ac] ss:$16 sps:$4 sm:$0xff]   ;;  %v5322_v20 = vld [vmem:[%s7704_s2 + $0x1a8] ss:$16 sps:$4 sm:$0xff]  }
  0x85   :  { %v5325_v21 = vld [vmem:[%s7704_s2 + $0x3a8] ss:$16 sps:$4 sm:$0xff]  }
  0x87   :  { %1855 = vmatpush1.bf16.msra.mxu0 %v5234_v22  ;;  %1896 = vmatpush1.bf16.msra.mxu1 %v5237_v23  ;;  %v5330_v22 = vld [vmem:[%s7704_s2 + $0x1cc] ss:$16 sps:$4 sm:$0xff]  }
  0x88   :  { %1906 = vmatprep.subr.bf16.mxu0 %v5246_v24  ;;  %1947 = vmatprep.subr.bf16.mxu1 %v5249_v25  ;;  %v5333_v23 = vld [vmem:[%s7704_s2 + $0x3cc] ss:$16 sps:$4 sm:$0xff]   ;;  %v5328_v24 = vld [vmem:[%s7704_s2 + $0x1c8] ss:$16 sps:$4 sm:$0xff]  }
  0x89   :  { %v5331_v25 = vld [vmem:[%s7704_s2 + $0x3c8] ss:$16 sps:$4 sm:$0xff]  }
  0x8a   :  { %1857 = vmatmul.mubr.bf16.vlgmr.msra.gmra.mrb[8].mxu0 %v6370_v26  ;;  %1898 = vmatmul.mubr.bf16.vlgmr.msra.gmra.mrb[8].mxu1 %v6374_v27 }
  0x8b   :  { %1907 = vmatpush1.bf16.msra.mxu0 %v5244_v28  ;;  %1948 = vmatpush1.bf16.msra.mxu1 %v5247_v29  ;;  %v5336_v28 = vld [vmem:[%s7704_s2 + $0x1ec] ss:$16 sps:$4 sm:$0xff]  }
  0x8c   :  { %1908 = vmatprep.subr.bf16.mxu0 %v5252_v30  ;;  %1949 = vmatprep.subr.bf16.mxu1 %v5255_v31  ;;  %v5339_v29 = vld [vmem:[%s7704_s2 + $0x3ec] ss:$16 sps:$4 sm:$0xff]   ;;  %v5334_v30 = vld [vmem:[%s7704_s2 + $0x1e8] ss:$16 sps:$4 sm:$0xff]  }
  0x8d   :  { %1938 = vmatprep.mubr.bf16.mxu0 %v6084_v58  ;;  %1979 = vmatprep.mubr.bf16.mxu1 %v6086_v59  ;;  %v5267_v58 = vld [vmem:[%s7704_s2 + $0x26c] ss:$16 sps:$4 sm:$0xff]   ;;  %v5262_v59 = vld [vmem:[%s7704_s2 + $0x68] ss:$16 sps:$4 sm:$0xff]  }
  0x8e   :  { %v5337_v31 = vld [vmem:[%s7704_s2 + $0x3e8] ss:$16 sps:$4 sm:$0xff]  }
  0x8f   :  { %1909 = vmatpush1.bf16.msra.mxu0 %v5250_v32  ;;  %1950 = vmatpush1.bf16.msra.mxu1 %v5253_v33  ;;  %v5342_v32 = vld [vmem:[%s7704_s2 + $0x40c] ss:$16 sps:$4 sm:$0xff]  }
  0x90   :  { %1910 = vmatprep.subr.bf16.mxu0 %v5258_v34  ;;  %1951 = vmatprep.subr.bf16.mxu1 %v5261_v35  ;;  %v5345_v33 = vld [vmem:[%s7704_s2 + $0x60c] ss:$16 sps:$4 sm:$0xff]   ;;  %v5340_v34 = vld [vmem:[%s7704_s2 + $0x408] ss:$16 sps:$4 sm:$0xff]  }
  0x91   :  { %v5343_v35 = vld [vmem:[%s7704_s2 + $0x608] ss:$16 sps:$4 sm:$0xff]  }
  0x93   :  { %1911 = vmatpush1.bf16.msra.mxu0 %v5256_v36  ;;  %1952 = vmatpush1.bf16.msra.mxu1 %v5259_v37  ;;  %v5348_v36 = vld [vmem:[%s7704_s2 + $0x42c] ss:$16 sps:$4 sm:$0xff]  }
  0x94   :  { %1912 = vmatprep.subr.bf16.mxu0 %v5264_v38  ;;  %1953 = vmatprep.subr.bf16.mxu1 %v5267_v58  ;;  %v5351_v37 = vld [vmem:[%s7704_s2 + $0x62c] ss:$16 sps:$4 sm:$0xff]   ;;  %v5346_v38 = vld [vmem:[%s7704_s2 + $0x428] ss:$16 sps:$4 sm:$0xff]  }
  0x95   :  { %v5349_v58 = vld [vmem:[%s7704_s2 + $0x628] ss:$16 sps:$4 sm:$0xff]  }
  0x97   :  { %1913 = vmatpush1.bf16.msra.mxu0 %v5262_v59  ;;  %1954 = vmatpush1.bf16.msra.mxu1 %v5265_v39  ;;  %v5354_v59 = vld [vmem:[%s7704_s2 + $0x44c] ss:$16 sps:$4 sm:$0xff]   ;;  %v5355_v39 = vld [vmem:[%s7704_s2 + $0x648] ss:$16 sps:$4 sm:$0xff]  }
  0x98   :  { %1914 = vmatprep.subr.bf16.mxu0 %v5270_v40  ;;  %1955 = vmatprep.subr.bf16.mxu1 %v5273_v42  ;;  %v5360_v40 = vld [vmem:[%s7704_s2 + $0x46c] ss:$16 sps:$4 sm:$0xff]   ;;  %v5361_v42 = vld [vmem:[%s7704_s2 + $0x668] ss:$16 sps:$4 sm:$0xff]  }
  0x9b   :  { %1915 = vmatpush1.bf16.msra.mxu0 %v5268_v43  ;;  %1956 = vmatpush1.bf16.msra.mxu1 %v5271_v44  ;;  %v5366_v43 = vld [vmem:[%s7704_s2 + $0x48c] ss:$16 sps:$4 sm:$0xff]  }
  0x9c   :  { %1916 = vmatprep.subr.bf16.mxu0 %v5276_v46  ;;  %1957 = vmatprep.subr.bf16.mxu1 %v5279_v47  ;;  %v5369_v44 = vld [vmem:[%s7704_s2 + $0x68c] ss:$16 sps:$4 sm:$0xff]   ;;  %v5364_v46 = vld [vmem:[%s7704_s2 + $0x488] ss:$16 sps:$4 sm:$0xff]  }
  0x9d   :  { %v5367_v47 = vld [vmem:[%s7704_s2 + $0x688] ss:$16 sps:$4 sm:$0xff]  }
  0x9f   :  { %1917 = vmatpush1.bf16.msra.mxu0 %v5274_v48  ;;  %1958 = vmatpush1.bf16.msra.mxu1 %v5277_v49  ;;  %v5372_v48 = vld [vmem:[%s7704_s2 + $0x4ac] ss:$16 sps:$4 sm:$0xff]  }
  0xa0   :  { %1918 = vmatprep.subr.bf16.mxu0 %v5282_v50  ;;  %1959 = vmatprep.subr.bf16.mxu1 %v5285_v51  ;;  %v5375_v49 = vld [vmem:[%s7704_s2 + $0x6ac] ss:$16 sps:$4 sm:$0xff]   ;;  %v5370_v50 = vld [vmem:[%s7704_s2 + $0x4a8] ss:$16 sps:$4 sm:$0xff]  }
  0xa1   :  { %v5373_v51 = vld [vmem:[%s7704_s2 + $0x6a8] ss:$16 sps:$4 sm:$0xff]  }
  0xa3   :  { %1919 = vmatpush1.bf16.msra.mxu0 %v5280_v52  ;;  %1960 = vmatpush1.bf16.msra.mxu1 %v5283_v53  ;;  %v5378_v52 = vld [vmem:[%s7704_s2 + $0x4cc] ss:$16 sps:$4 sm:$0xff]  }
  0xa4   :  { %1920 = vmatprep.subr.bf16.mxu0 %v5288_v54  ;;  %1961 = vmatprep.subr.bf16.mxu1 %v5291_v55  ;;  %v5381_v53 = vld [vmem:[%s7704_s2 + $0x6cc] ss:$16 sps:$4 sm:$0xff]  }
  0xa7   :  { %1921 = vmatpush1.bf16.msra.mxu0 %v5286_v56  ;;  %1962 = vmatpush1.bf16.msra.mxu1 %v5289_v57  ;;  %v5376_v56 = vld [vmem:[%s7704_s2 + $0x4c8] ss:$16 sps:$4 sm:$0xff]  }
  0xa8   :  { %1922 = vmatprep.subr.bf16.mxu0 %v5294_v60  ;;  %1963 = vmatprep.subr.bf16.mxu1 %v5297_v61  ;;  %v5379_v61 = vld [vmem:[%s7704_s2 + $0x6c8] ss:$16 sps:$4 sm:$0xff]  }
  0xab   :  { %1923 = vmatpush1.bf16.msra.mxu0 %v5292_v62  ;;  %1964 = vmatpush1.bf16.msra.mxu1 %v5295_v63 }
  0xac   :  { %1924 = vmatprep.subr.bf16.mxu0 %v5300_v0  ;;  %1965 = vmatprep.subr.bf16.mxu1 %v5303_v1  ;;  %v5384_v0 = vld [vmem:[%s7704_s2 + $0x4ec] ss:$16 sps:$4 sm:$0xff]  }
  0xaf   :  { %1925 = vmatpush1.bf16.msra.mxu0 %v5298_v2  ;;  %1966 = vmatpush1.bf16.msra.mxu1 %v5301_v3  ;;  %v5387_v3 = vld [vmem:[%s7704_s2 + $0x6ec] ss:$16 sps:$4 sm:$0xff]  }
  0xb0   :  { %1926 = vmatprep.subr.bf16.mxu0 %v5306_v4  ;;  %1967 = vmatprep.subr.bf16.mxu1 %v5309_v5  ;;  %v5382_v4 = vld [vmem:[%s7704_s2 + $0x4e8] ss:$16 sps:$4 sm:$0xff]  }
  0xb1   :  { %v5385_v5 = vld [vmem:[%s7704_s2 + $0x6e8] ss:$16 sps:$4 sm:$0xff]  }
  0xb3   :  { %1927 = vmatpush1.bf16.msra.mxu0 %v5304_v6  ;;  %1968 = vmatpush1.bf16.msra.mxu1 %v5307_v7  ;;  %v5390_v6 = vld [vmem:[%s7704_s2 + $0x50c] ss:$16 sps:$4 sm:$0xff]  }
  0xb4   :  { %1928 = vmatprep.subr.bf16.mxu0 %v5312_v8  ;;  %1969 = vmatprep.subr.bf16.mxu1 %v5315_v9  ;;  %v5393_v7 = vld [vmem:[%s7704_s2 + $0x70c] ss:$16 sps:$4 sm:$0xff]   ;;  %v5388_v8 = vld [vmem:[%s7704_s2 + $0x508] ss:$16 sps:$4 sm:$0xff]  }
  0xb5   :  { %v5391_v9 = vld [vmem:[%s7704_s2 + $0x708] ss:$16 sps:$4 sm:$0xff]  }
  0xb7   :  { %1929 = vmatpush1.bf16.msra.mxu0 %v5310_v10  ;;  %1970 = vmatpush1.bf16.msra.mxu1 %v5313_v11  ;;  %v5396_v10 = vld [vmem:[%s7704_s2 + $0x52c] ss:$16 sps:$4 sm:$0xff]  }
  0xb8   :  { %1930 = vmatprep.subr.bf16.mxu0 %v5318_v12  ;;  %1971 = vmatprep.subr.bf16.mxu1 %v5321_v13  ;;  %v5399_v11 = vld [vmem:[%s7704_s2 + $0x72c] ss:$16 sps:$4 sm:$0xff]   ;;  %v5394_v12 = vld [vmem:[%s7704_s2 + $0x528] ss:$16 sps:$4 sm:$0xff]  }
  0xb9   :  { %v5397_v13 = vld [vmem:[%s7704_s2 + $0x728] ss:$16 sps:$4 sm:$0xff]  }
  0xbb   :  { %1931 = vmatpush1.bf16.msra.mxu0 %v5316_v14  ;;  %1972 = vmatpush1.bf16.msra.mxu1 %v5319_v15  ;;  %v5402_v14 = vld [vmem:[%s7704_s2 + $0x54c] ss:$16 sps:$4 sm:$0xff]  }
  0xbc   :  { %1932 = vmatprep.subr.bf16.mxu0 %v5324_v18  ;;  %1973 = vmatprep.subr.bf16.mxu1 %v5327_v19  ;;  %v5405_v15 = vld [vmem:[%s7704_s2 + $0x74c] ss:$16 sps:$4 sm:$0xff]   ;;  %v5400_v18 = vld [vmem:[%s7704_s2 + $0x548] ss:$16 sps:$4 sm:$0xff]  }
  0xbd   :  { %v5403_v19 = vld [vmem:[%s7704_s2 + $0x748] ss:$16 sps:$4 sm:$0xff]  }
  0xbf   :  { %1933 = vmatpush1.bf16.msra.mxu0 %v5322_v20  ;;  %1974 = vmatpush1.bf16.msra.mxu1 %v5325_v21  ;;  %v5408_v20 = vld [vmem:[%s7704_s2 + $0x56c] ss:$16 sps:$4 sm:$0xff]  }
  0xc0   :  { %1934 = vmatprep.subr.bf16.mxu0 %v5330_v22  ;;  %1975 = vmatprep.subr.bf16.mxu1 %v5333_v23  ;;  %v5411_v21 = vld [vmem:[%s7704_s2 + $0x76c] ss:$16 sps:$4 sm:$0xff]   ;;  %v5406_v22 = vld [vmem:[%s7704_s2 + $0x568] ss:$16 sps:$4 sm:$0xff]  }
  0xc1   :  { %v5409_v23 = vld [vmem:[%s7704_s2 + $0x768] ss:$16 sps:$4 sm:$0xff]  }
  0xc3   :  { %1935 = vmatpush1.bf16.msra.mxu0 %v5328_v24  ;;  %1976 = vmatpush1.bf16.msra.mxu1 %v5331_v25  ;;  %v5414_v24 = vld [vmem:[%s7704_s2 + $0x58c] ss:$16 sps:$4 sm:$0xff]  }
  0xc4   :  { %1936 = vmatprep.subr.bf16.mxu0 %v5336_v28  ;;  %1977 = vmatprep.subr.bf16.mxu1 %v5339_v29  ;;  %v5417_v25 = vld [vmem:[%s7704_s2 + $0x78c] ss:$16 sps:$4 sm:$0xff]   ;;  %v5412_v28 = vld [vmem:[%s7704_s2 + $0x588] ss:$16 sps:$4 sm:$0xff]  }
  0xc5   :  { %v5415_v29 = vld [vmem:[%s7704_s2 + $0x788] ss:$16 sps:$4 sm:$0xff]  }
  0xc7   :  { %1937 = vmatpush1.bf16.msra.mxu0 %v5334_v30  ;;  %1978 = vmatpush1.bf16.msra.mxu1 %v5337_v31  ;;  %v5420_v30 = vld [vmem:[%s7704_s2 + $0x5ac] ss:$16 sps:$4 sm:$0xff]  }
  0xc8   :  { %1988 = vmatprep.subr.bf16.mxu0 %v5342_v32  ;;  %2029 = vmatprep.subr.bf16.mxu1 %v5345_v33  ;;  %v5423_v31 = vld [vmem:[%s7704_s2 + $0x7ac] ss:$16 sps:$4 sm:$0xff]   ;;  %v5418_v32 = vld [vmem:[%s7704_s2 + $0x5a8] ss:$16 sps:$4 sm:$0xff]  }
  0xc9   :  { %v5421_v33 = vld [vmem:[%s7704_s2 + $0x7a8] ss:$16 sps:$4 sm:$0xff]  }
  0xca   :  { %1939 = vmatmul.mubr.bf16.vlgmr.msra.gmra.mrb[12].mxu0 %v6150_v16  ;;  %1980 = vmatmul.mubr.bf16.vlgmr.msra.gmra.mrb[12].mxu1 %v6152_v17  ;;  %v5357_v16 = vld [vmem:[%s7704_s2 + $0x64c] ss:$16 sps:$4 sm:$0xff]   ;;  %v5352_v17 = vld [vmem:[%s7704_s2 + $0x448] ss:$16 sps:$4 sm:$0xff]  }
  0xcb   :  { %1989 = vmatpush1.bf16.msra.mxu0 %v5340_v34  ;;  %2030 = vmatpush1.bf16.msra.mxu1 %v5343_v35  ;;  %v5426_v34 = vld [vmem:[%s7704_s2 + $0x5cc] ss:$16 sps:$4 sm:$0xff]  }
  0xcc   :  { %1990 = vmatprep.subr.bf16.mxu0 %v5348_v36  ;;  %2031 = vmatprep.subr.bf16.mxu1 %v5351_v37  ;;  %v5429_v35 = vld [vmem:[%s7704_s2 + $0x7cc] ss:$16 sps:$4 sm:$0xff]   ;;  %v5424_v36 = vld [vmem:[%s7704_s2 + $0x5c8] ss:$16 sps:$4 sm:$0xff]  }
  0xcd   :  { %2020 = vmatprep.mubr.bf16.mxu0 %v6229_v41  ;;  %2061 = vmatprep.mubr.bf16.mxu1 %v6244_v45  ;;  %v5363_v41 = vld [vmem:[%s7704_s2 + $0x66c] ss:$16 sps:$4 sm:$0xff]   ;;  %v5358_v45 = vld [vmem:[%s7704_s2 + $0x468] ss:$16 sps:$4 sm:$0xff]  }
  0xce   :  { %v5427_v37 = vld [vmem:[%s7704_s2 + $0x7c8] ss:$16 sps:$4 sm:$0xff]  }
  0xcf   :  { %1991 = vmatpush1.bf16.msra.mxu0 %v5346_v38  ;;  %2032 = vmatpush1.bf16.msra.mxu1 %v5349_v58  ;;  %v5432_v38 = vld [vmem:[%s7704_s2 + $0x5ec] ss:$16 sps:$4 sm:$0xff]  }
  0xd0   :  { %1992 = vmatprep.subr.bf16.mxu0 %v5354_v59  ;;  %2033 = vmatprep.subr.bf16.mxu1 %v5357_v16  ;;  %v5435_v58 = vld [vmem:[%s7704_s2 + $0x7ec] ss:$16 sps:$4 sm:$0xff]   ;;  %v5430_v59 = vld [vmem:[%s7704_s2 + $0x5e8] ss:$16 sps:$4 sm:$0xff]  }
  0xd1   :  { %v5433_v16 = vld [vmem:[%s7704_s2 + $0x7e8] ss:$16 sps:$4 sm:$0xff]  }
  0xd3   :  { %1993 = vmatpush1.bf16.msra.mxu0 %v5352_v17  ;;  %2034 = vmatpush1.bf16.msra.mxu1 %v5355_v39  ;;  %v5438_v17 = vld [vmem:[%s7706_s5 + $0x4] ss:$16 sps:$4 sm:$0xff]   ;;  %v5441_v39 = vld [vmem:[%s7706_s5 + $0xc] ss:$16 sps:$4 sm:$0xff]  }
  0xd4   :  { %1994 = vmatprep.subr.bf16.mxu0 %v5360_v40  ;;  %2035 = vmatprep.subr.bf16.mxu1 %v5363_v41  ;;  %v5436_v40 = vld [vmem:[%s7706_s5] ss:$16 sps:$4 sm:$0xff]   ;;  %v5439_v41 = vld [vmem:[%s7706_s5 + $0x8] ss:$16 sps:$4 sm:$0xff]  }
  0xd7   :  { %1995 = vmatpush1.bf16.msra.mxu0 %v5358_v45  ;;  %2036 = vmatpush1.bf16.msra.mxu1 %v5361_v42  ;;  %v5444_v45 = vld [vmem:[%s7706_s5 + $0x24] ss:$16 sps:$4 sm:$0xff]   ;;  %v5447_v42 = vld [vmem:[%s7706_s5 + $0x2c] ss:$16 sps:$4 sm:$0xff]  }
  0xd8   :  { %1996 = vmatprep.subr.bf16.mxu0 %v5366_v43  ;;  %2037 = vmatprep.subr.bf16.mxu1 %v5369_v44  ;;  %v5442_v43 = vld [vmem:[%s7706_s5 + $0x20] ss:$16 sps:$4 sm:$0xff]   ;;  %v5445_v44 = vld [vmem:[%s7706_s5 + $0x28] ss:$16 sps:$4 sm:$0xff]  }
  0xdb   :  { %1997 = vmatpush1.bf16.msra.mxu0 %v5364_v46  ;;  %2038 = vmatpush1.bf16.msra.mxu1 %v5367_v47  ;;  %v5450_v46 = vld [vmem:[%s7706_s5 + $0x44] ss:$16 sps:$4 sm:$0xff]   ;;  %v5451_v47 = vld [vmem:[%s7706_s5 + $0x48] ss:$16 sps:$4 sm:$0xff]  }
  0xdc   :  { %1998 = vmatprep.subr.bf16.mxu0 %v5372_v48  ;;  %2039 = vmatprep.subr.bf16.mxu1 %v5375_v49  ;;  %v5456_v48 = vld [vmem:[%s7706_s5 + $0x64] ss:$16 sps:$4 sm:$0xff]   ;;  %v5459_v49 = vld [vmem:[%s7706_s5 + $0x6c] ss:$16 sps:$4 sm:$0xff]  }
  0xdd   :  { %v6648_v54 = vpop.f32.mrb[0].mxu0  ;;  %v6650_v55 = vpop.f32.mrb[0].mxu1 }
  0xde   :  { %v6655_v57 = vpop.f32.mrb[1].mxu0  ;;  %v6657_v60 = vpop.f32.mrb[1].mxu1 }
  0xdf   :  { %v390_v62 = vpop.f32.mrb[2].mxu0  ;;  %v431_v63 = vpop.f32.mrb[2].mxu1  ;;  %1999 = vmatpush1.bf16.msra.mxu0 %v5370_v50  ;;  %2040 = vmatpush1.bf16.msra.mxu1 %v5373_v51  ;;  %v5454_v50 = vld [vmem:[%s7706_s5 + $0x60] ss:$16 sps:$4 sm:$0xff]   ;;  %v5457_v51 = vld [vmem:[%s7706_s5 + $0x68] ss:$16 sps:$4 sm:$0xff]  }
  0xe0   :  { %v391_v1 = vpop.f32.mrb[3].mxu0  ;;  %v432_v2 = vpop.f32.mrb[3].mxu1  ;;  %2000 = vmatprep.subr.bf16.mxu0 %v5378_v52  ;;  %2041 = vmatprep.subr.bf16.mxu1 %v5381_v53  ;;  %v5462_v52 = vld [vmem:[%s7706_s5 + $0x84] ss:$16 sps:$4 sm:$0xff]   ;;  %v5465_v53 = vld [vmem:[%s7706_s5 + $0x8c] ss:$16 sps:$4 sm:$0xff]  }
  0xe1   :  { %v5468_v62 = vld [vmem:[%s7706_s5 + $0xa4] ss:$16 sps:$4 sm:$0xff]   ;;  %v5471_v63 = vld [vmem:[%s7706_s5 + $0xac] ss:$16 sps:$4 sm:$0xff]   ;;  %v5469_v1 = vld [vmem:[%s7706_s5 + $0xa8] ss:$16 sps:$4 sm:$0xff]  }
  0xe2   :  { %v5474_v2 = vld [vmem:[%s7706_s5 + $0xc4] ss:$16 sps:$4 sm:$0xff]  }
  0xe3   :  { %2001 = vmatpush1.bf16.msra.mxu0 %v5376_v56  ;;  %2042 = vmatpush1.bf16.msra.mxu1 %v5379_v61  ;;  %v5460_v56 = vld [vmem:[%s7706_s5 + $0x80] ss:$16 sps:$4 sm:$0xff]   ;;  %v5463_v61 = vld [vmem:[%s7706_s5 + $0x88] ss:$16 sps:$4 sm:$0xff]  }
  0xe4   :  { %2002 = vmatprep.subr.bf16.mxu0 %v5384_v0  ;;  %2043 = vmatprep.subr.bf16.mxu1 %v5387_v3  ;;  %v5466_v0 = vld [vmem:[%s7706_s5 + $0xa0] ss:$16 sps:$4 sm:$0xff]   ;;  %v5477_v3 = vld [vmem:[%s7706_s5 + $0xcc] ss:$16 sps:$4 sm:$0xff]  }
  0xe7   :  { %2003 = vmatpush1.bf16.msra.mxu0 %v5382_v4  ;;  %2044 = vmatpush1.bf16.msra.mxu1 %v5385_v5 }
  0xe8   :  { %2004 = vmatprep.subr.bf16.mxu0 %v5390_v6  ;;  %2045 = vmatprep.subr.bf16.mxu1 %v5393_v7 }
  0xeb   :  { %2005 = vmatpush1.bf16.msra.mxu0 %v5388_v8  ;;  %2046 = vmatpush1.bf16.msra.mxu1 %v5391_v9 }
  0xec   :  { %2006 = vmatprep.subr.bf16.mxu0 %v5396_v10  ;;  %2047 = vmatprep.subr.bf16.mxu1 %v5399_v11 }
  0xef   :  { %2007 = vmatpush1.bf16.msra.mxu0 %v5394_v12  ;;  %2048 = vmatpush1.bf16.msra.mxu1 %v5397_v13  ;;  %v5472_v12 = vld [vmem:[%s7706_s5 + $0xc0] ss:$16 sps:$4 sm:$0xff]   ;;  %v5475_v13 = vld [vmem:[%s7706_s5 + $0xc8] ss:$16 sps:$4 sm:$0xff]  }
  0xf0   :  { %2008 = vmatprep.subr.bf16.mxu0 %v5402_v14  ;;  %2049 = vmatprep.subr.bf16.mxu1 %v5405_v15 }
  0xf3   :  { %2009 = vmatpush1.bf16.msra.mxu0 %v5400_v18  ;;  %2050 = vmatpush1.bf16.msra.mxu1 %v5403_v19  ;;  %v5483_v18 = vld [vmem:[%s7706_s5 + $0xec] ss:$16 sps:$4 sm:$0xff]  }
  0xf4   :  { %2010 = vmatprep.subr.bf16.mxu0 %v5408_v20  ;;  %2051 = vmatprep.subr.bf16.mxu1 %v5411_v21  ;;  %v5478_v20 = vld [vmem:[%s7706_s5 + $0xe0] ss:$16 sps:$4 sm:$0xff]   ;;  %v5481_v21 = vld [vmem:[%s7706_s5 + $0xe8] ss:$16 sps:$4 sm:$0xff]  }
  0xf7   :  { %2011 = vmatpush1.bf16.msra.mxu0 %v5406_v22  ;;  %2052 = vmatpush1.bf16.msra.mxu1 %v5409_v23  ;;  %v5486_v22 = vld [vmem:[%s7706_s5 + $0x104] ss:$16 sps:$4 sm:$0xff]   ;;  %v5489_v23 = vld [vmem:[%s7706_s5 + $0x10c] ss:$16 sps:$4 sm:$0xff]  }
  0xf8   :  { %2012 = vmatprep.subr.bf16.mxu0 %v5414_v24  ;;  %2053 = vmatprep.subr.bf16.mxu1 %v5417_v25  ;;  %v5484_v24 = vld [vmem:[%s7706_s5 + $0x100] ss:$16 sps:$4 sm:$0xff]   ;;  %v5487_v25 = vld [vmem:[%s7706_s5 + $0x108] ss:$16 sps:$4 sm:$0xff]  }
  0xfb   :  { %2013 = vmatpush1.bf16.msra.mxu0 %v5412_v28  ;;  %2054 = vmatpush1.bf16.msra.mxu1 %v5415_v29  ;;  %v5492_v28 = vld [vmem:[%s7706_s5 + $0x124] ss:$16 sps:$4 sm:$0xff]   ;;  %v5495_v29 = vld [vmem:[%s7706_s5 + $0x12c] ss:$16 sps:$4 sm:$0xff]  }
  0xfc   :  { %2014 = vmatprep.subr.bf16.mxu0 %v5420_v30  ;;  %2055 = vmatprep.subr.bf16.mxu1 %v5423_v31  ;;  %v5490_v30 = vld [vmem:[%s7706_s5 + $0x120] ss:$16 sps:$4 sm:$0xff]   ;;  %v5493_v31 = vld [vmem:[%s7706_s5 + $0x128] ss:$16 sps:$4 sm:$0xff]  }
  0xff   :  { %2015 = vmatpush1.bf16.msra.mxu0 %v5418_v32  ;;  %2056 = vmatpush1.bf16.msra.mxu1 %v5421_v33  ;;  %v5498_v32 = vld [vmem:[%s7706_s5 + $0x144] ss:$16 sps:$4 sm:$0xff]   ;;  %v5501_v33 = vld [vmem:[%s7706_s5 + $0x14c] ss:$16 sps:$4 sm:$0xff]  }
 0x100   :  { %2016 = vmatprep.subr.bf16.mxu0 %v5426_v34  ;;  %2057 = vmatprep.subr.bf16.mxu1 %v5429_v35  ;;  %v5496_v34 = vld [vmem:[%s7706_s5 + $0x140] ss:$16 sps:$4 sm:$0xff]   ;;  %v5499_v35 = vld [vmem:[%s7706_s5 + $0x148] ss:$16 sps:$4 sm:$0xff]  }
 0x103   :  { %2017 = vmatpush1.bf16.msra.mxu0 %v5424_v36  ;;  %2058 = vmatpush1.bf16.msra.mxu1 %v5427_v37  ;;  %v5504_v36 = vld [vmem:[%s7706_s5 + $0x164] ss:$16 sps:$4 sm:$0xff]   ;;  %v5507_v37 = vld [vmem:[%s7706_s5 + $0x16c] ss:$16 sps:$4 sm:$0xff]  }
 0x104   :  { %2018 = vmatprep.subr.bf16.mxu0 %v5432_v38  ;;  %2059 = vmatprep.subr.bf16.mxu1 %v5435_v58  ;;  %v5502_v38 = vld [vmem:[%s7706_s5 + $0x160] ss:$16 sps:$4 sm:$0xff]   ;;  %v5505_v58 = vld [vmem:[%s7706_s5 + $0x168] ss:$16 sps:$4 sm:$0xff]  }
 0x107   :  { %2019 = vmatpush1.bf16.msra.mxu0 %v5430_v59  ;;  %2060 = vmatpush1.bf16.msra.mxu1 %v5433_v16  ;;  %v5510_v59 = vld [vmem:[%s7706_s5 + $0x184] ss:$16 sps:$4 sm:$0xff]   ;;  %v5513_v16 = vld [vmem:[%s7706_s5 + $0x18c] ss:$16 sps:$4 sm:$0xff]  }
 0x108   :  { %2902 = vmatprep.subr.bf16.mxu0 %v5438_v17  ;;  %2984 = vmatprep.subr.bf16.mxu1 %v5441_v39  ;;  %v5508_v17 = vld [vmem:[%s7706_s5 + $0x180] ss:$16 sps:$4 sm:$0xff]   ;;  %v5511_v39 = vld [vmem:[%s7706_s5 + $0x188] ss:$16 sps:$4 sm:$0xff]  }
 0x10a   :  { %2021 = vmatmul.mubr.bf16.vlgmr.msra.gmra.mrb[16].mxu0 %v6370_v26  ;;  %2062 = vmatmul.mubr.bf16.vlgmr.msra.gmra.mrb[16].mxu1 %v6374_v27  ;;  %v5453_v26 = vld [vmem:[%s7706_s5 + $0x4c] ss:$16 sps:$4 sm:$0xff]   ;;  %v5448_v27 = vld [vmem:[%s7706_s5 + $0x40] ss:$16 sps:$4 sm:$0xff]  }
 0x10b   :  { %2903 = vmatpush1.bf16.msra.mxu0 %v5436_v40  ;;  %2985 = vmatpush1.bf16.msra.mxu1 %v5439_v41  ;;  %v5516_v40 = vld [vmem:[%s7706_s5 + $0x1a4] ss:$16 sps:$4 sm:$0xff]   ;;  %v5519_v41 = vld [vmem:[%s7706_s5 + $0x1ac] ss:$16 sps:$4 sm:$0xff]  }
 0x10c   :  { %2904 = vmatprep.subr.bf16.mxu0 %v5444_v45  ;;  %2986 = vmatprep.subr.bf16.mxu1 %v5447_v42  ;;  %v5514_v45 = vld [vmem:[%s7706_s5 + $0x1a0] ss:$16 sps:$4 sm:$0xff]   ;;  %v5517_v42 = vld [vmem:[%s7706_s5 + $0x1a8] ss:$16 sps:$4 sm:$0xff]  }
 0x10f   :  { %2905 = vmatpush1.bf16.msra.mxu0 %v5442_v43  ;;  %2987 = vmatpush1.bf16.msra.mxu1 %v5445_v44  ;;  %v5522_v43 = vld [vmem:[%s7706_s5 + $0x1c4] ss:$16 sps:$4 sm:$0xff]   ;;  %v5525_v44 = vld [vmem:[%s7706_s5 + $0x1cc] ss:$16 sps:$4 sm:$0xff]  }
 0x110   :  { %2906 = vmatprep.subr.bf16.mxu0 %v5450_v46  ;;  %2988 = vmatprep.subr.bf16.mxu1 %v5453_v26  ;;  %v5520_v46 = vld [vmem:[%s7706_s5 + $0x1c0] ss:$16 sps:$4 sm:$0xff]   ;;  %v5523_v26 = vld [vmem:[%s7706_s5 + $0x1c8] ss:$16 sps:$4 sm:$0xff]  }
 0x113   :  { %2907 = vmatpush1.bf16.msra.mxu0 %v5448_v27  ;;  %2989 = vmatpush1.bf16.msra.mxu1 %v5451_v47  ;;  %v5528_v27 = vld [vmem:[%s7706_s5 + $0x1e4] ss:$16 sps:$4 sm:$0xff]   ;;  %v5531_v47 = vld [vmem:[%s7706_s5 + $0x1ec] ss:$16 sps:$4 sm:$0xff]  }
 0x114   :  { %2908 = vmatprep.subr.bf16.mxu0 %v5456_v48  ;;  %2990 = vmatprep.subr.bf16.mxu1 %v5459_v49  ;;  %v5526_v48 = vld [vmem:[%s7706_s5 + $0x1e0] ss:$16 sps:$4 sm:$0xff]   ;;  %v5529_v49 = vld [vmem:[%s7706_s5 + $0x1e8] ss:$16 sps:$4 sm:$0xff]  }
 0x117   :  { %2909 = vmatpush1.bf16.msra.mxu0 %v5454_v50  ;;  %2991 = vmatpush1.bf16.msra.mxu1 %v5457_v51  ;;  %v5534_v50 = vld [vmem:[%s7706_s5 + $0x204] ss:$16 sps:$4 sm:$0xff]   ;;  %v5537_v51 = vld [vmem:[%s7706_s5 + $0x20c] ss:$16 sps:$4 sm:$0xff]  }
 0x118   :  { %2910 = vmatprep.subr.bf16.mxu0 %v5462_v52  ;;  %2992 = vmatprep.subr.bf16.mxu1 %v5465_v53  ;;  %v2072_v52 = vlaneseq }
 0x11a   :  { %v6976_v53 = vshrl.u32 %v2072_v52, 7  ;;  %v5591_v52 = vld [vmem:[%s7706_s5 + $0x32c] ss:$16 sps:$4 sm:$0xff]  }
 0x11b   :  { %2911 = vmatpush1.bf16.msra.mxu0 %v5460_v56  ;;  %2993 = vmatpush1.bf16.msra.mxu1 %v5463_v61  ;;  %v6984_v61 = vld [vmem:[%s7707_s4] sm:$0xf] }
 0x11c   :  { %2912 = vmatprep.subr.bf16.mxu0 %v5468_v62  ;;  %2994 = vmatprep.subr.bf16.mxu1 %v5471_v63  ;;  %v6979_v56 = vsub.s32 0, %v6976_v53  ;;  %v6987_v62 = vsub.s32 1, %v6976_v53 }
 0x11d   :  { %v1776_v4 = vpop.f32.mrb[4].mxu0  ;;  %v1817_v5 = vpop.f32.mrb[4].mxu1 }
 0x11e   :  { %v1777_v6 = vadd.f32 %v1776_v4, %v6648_v54  ;;  %v1778_v7 = vpop.f32.mrb[5].mxu0  ;;  %v1819_v8 = vpop.f32.mrb[5].mxu1 }
 0x11f   :  { %v1779_v9 = vadd.f32 %v1778_v7, %v6655_v57  ;;  %v1780_v10 = vpop.f32.mrb[6].mxu0  ;;  %v1821_v11 = vpop.f32.mrb[6].mxu1  ;;  %2913 = vmatpush1.bf16.msra.mxu0 %v5466_v0  ;;  %2995 = vmatpush1.bf16.msra.mxu1 %v5469_v1  ;;  %v5480_v57 = vld [vmem:[%s7706_s5 + $0xe4] ss:$16 sps:$4 sm:$0xff]  }
 0x120   :  { %v6858_v14 = vadd.f32 %v1817_v5, %v1777_v6  ;;  %v1781_v15 = vpop.f32.mrb[7].mxu0  ;;  %v1822_v54 = vpop.f32.mrb[7].mxu1  ;;  %2914 = vmatprep.subr.bf16.mxu0 %v5474_v2  ;;  %2996 = vmatprep.subr.bf16.mxu1 %v5477_v3  ;;  %v2075_v2 = vrot.slane %v6984_v61, %v6979_v56  ;;  %v2079_v6 = vrot.slane %v6984_v61, %v6987_v62 }
 0x121   :  { %v6866_v19 = vadd.f32 %v1819_v8, %v1779_v9 }
 0x123   :  { %2915 = vmatpush1.bf16.msra.mxu0 %v5472_v12  ;;  %2997 = vmatpush1.bf16.msra.mxu1 %v5475_v13 }
 0x124   :  { %2916 = vmatprep.subr.bf16.mxu0 %v5480_v57  ;;  %2998 = vmatprep.subr.bf16.mxu1 %v5483_v18 }
 0x127   :  { %2917 = vmatpush1.bf16.msra.mxu0 %v5478_v20  ;;  %2999 = vmatpush1.bf16.msra.mxu1 %v5481_v21  ;;  %v5535_v21 = vld [vmem:[%s7706_s5 + $0x208] ss:$16 sps:$4 sm:$0xff]  }
 0x128   :  { %2918 = vmatprep.subr.bf16.mxu0 %v5486_v22  ;;  %3000 = vmatprep.subr.bf16.mxu1 %v5489_v23  ;;  %v5540_v23 = vld [vmem:[%s7706_s5 + $0x224] ss:$16 sps:$4 sm:$0xff]  }
 0x12b   :  { %2919 = vmatpush1.bf16.msra.mxu0 %v5484_v24  ;;  %3001 = vmatpush1.bf16.msra.mxu1 %v5487_v25  ;;  %v5543_v24 = vld [vmem:[%s7706_s5 + $0x22c] ss:$16 sps:$4 sm:$0xff]   ;;  %v5538_v25 = vld [vmem:[%s7706_s5 + $0x220] ss:$16 sps:$4 sm:$0xff]  }
 0x12c   :  { %2920 = vmatprep.subr.bf16.mxu0 %v5492_v28  ;;  %3002 = vmatprep.subr.bf16.mxu1 %v5495_v29  ;;  %v5541_v28 = vld [vmem:[%s7706_s5 + $0x228] ss:$16 sps:$4 sm:$0xff]   ;;  %v5546_v29 = vld [vmem:[%s7706_s5 + $0x244] ss:$16 sps:$4 sm:$0xff]  }
 0x12f   :  { %2921 = vmatpush1.bf16.msra.mxu0 %v5490_v30  ;;  %3003 = vmatpush1.bf16.msra.mxu1 %v5493_v31  ;;  %v5549_v30 = vld [vmem:[%s7706_s5 + $0x24c] ss:$16 sps:$4 sm:$0xff]   ;;  %v5544_v31 = vld [vmem:[%s7706_s5 + $0x240] ss:$16 sps:$4 sm:$0xff]  }
 0x130   :  { %2922 = vmatprep.subr.bf16.mxu0 %v5498_v32  ;;  %3004 = vmatprep.subr.bf16.mxu1 %v5501_v33  ;;  %v5547_v32 = vld [vmem:[%s7706_s5 + $0x248] ss:$16 sps:$4 sm:$0xff]   ;;  %v5552_v33 = vld [vmem:[%s7706_s5 + $0x264] ss:$16 sps:$4 sm:$0xff]  }
 0x133   :  { %2923 = vmatpush1.bf16.msra.mxu0 %v5496_v34  ;;  %3005 = vmatpush1.bf16.msra.mxu1 %v5499_v35  ;;  %v5555_v34 = vld [vmem:[%s7706_s5 + $0x26c] ss:$16 sps:$4 sm:$0xff]   ;;  %v5550_v35 = vld [vmem:[%s7706_s5 + $0x260] ss:$16 sps:$4 sm:$0xff]  }
 0x134   :  { %2924 = vmatprep.subr.bf16.mxu0 %v5504_v36  ;;  %3006 = vmatprep.subr.bf16.mxu1 %v5507_v37  ;;  %v5553_v36 = vld [vmem:[%s7706_s5 + $0x268] ss:$16 sps:$4 sm:$0xff]   ;;  %v5558_v37 = vld [vmem:[%s7706_s5 + $0x284] ss:$16 sps:$4 sm:$0xff]  }
 0x137   :  { %2925 = vmatpush1.bf16.msra.mxu0 %v5502_v38  ;;  %3007 = vmatpush1.bf16.msra.mxu1 %v5505_v58  ;;  %v5561_v38 = vld [vmem:[%s7706_s5 + $0x28c] ss:$16 sps:$4 sm:$0xff]   ;;  %v5556_v58 = vld [vmem:[%s7706_s5 + $0x280] ss:$16 sps:$4 sm:$0xff]  }
 0x138   :  { %2926 = vmatprep.subr.bf16.mxu0 %v5510_v59  ;;  %3008 = vmatprep.subr.bf16.mxu1 %v5513_v16  ;;  %v5559_v59 = vld [vmem:[%s7706_s5 + $0x288] ss:$16 sps:$4 sm:$0xff]   ;;  %v5564_v16 = vld [vmem:[%s7706_s5 + $0x2a4] ss:$16 sps:$4 sm:$0xff]  }
 0x13b   :  { %2927 = vmatpush1.bf16.msra.mxu0 %v5508_v17  ;;  %3009 = vmatpush1.bf16.msra.mxu1 %v5511_v39  ;;  %v5567_v17 = vld [vmem:[%s7706_s5 + $0x2ac] ss:$16 sps:$4 sm:$0xff]   ;;  %v5562_v39 = vld [vmem:[%s7706_s5 + $0x2a0] ss:$16 sps:$4 sm:$0xff]  }
 0x13c   :  { %2928 = vmatprep.subr.bf16.mxu0 %v5516_v40  ;;  %3010 = vmatprep.subr.bf16.mxu1 %v5519_v41  ;;  %v5565_v40 = vld [vmem:[%s7706_s5 + $0x2a8] ss:$16 sps:$4 sm:$0xff]   ;;  %v5570_v41 = vld [vmem:[%s7706_s5 + $0x2c4] ss:$16 sps:$4 sm:$0xff]  }
 0x13f   :  { %2929 = vmatpush1.bf16.msra.mxu0 %v5514_v45  ;;  %3011 = vmatpush1.bf16.msra.mxu1 %v5517_v42  ;;  %v5573_v45 = vld [vmem:[%s7706_s5 + $0x2cc] ss:$16 sps:$4 sm:$0xff]   ;;  %v5568_v42 = vld [vmem:[%s7706_s5 + $0x2c0] ss:$16 sps:$4 sm:$0xff]  }
 0x140   :  { %2930 = vmatprep.subr.bf16.mxu0 %v5522_v43  ;;  %3012 = vmatprep.subr.bf16.mxu1 %v5525_v44  ;;  %v5571_v43 = vld [vmem:[%s7706_s5 + $0x2c8] ss:$16 sps:$4 sm:$0xff]   ;;  %v5576_v44 = vld [vmem:[%s7706_s5 + $0x2e4] ss:$16 sps:$4 sm:$0xff]  }
 0x143   :  { %2931 = vmatpush1.bf16.msra.mxu0 %v5520_v46  ;;  %3013 = vmatpush1.bf16.msra.mxu1 %v5523_v26  ;;  %v5579_v46 = vld [vmem:[%s7706_s5 + $0x2ec] ss:$16 sps:$4 sm:$0xff]   ;;  %v5574_v26 = vld [vmem:[%s7706_s5 + $0x2e0] ss:$16 sps:$4 sm:$0xff]  }
 0x144   :  { %2932 = vmatprep.subr.bf16.mxu0 %v5528_v27  ;;  %3014 = vmatprep.subr.bf16.mxu1 %v5531_v47  ;;  %v5577_v27 = vld [vmem:[%s7706_s5 + $0x2e8] ss:$16 sps:$4 sm:$0xff]   ;;  %v5582_v47 = vld [vmem:[%s7706_s5 + $0x304] ss:$16 sps:$4 sm:$0xff]  }
 0x147   :  { %2933 = vmatpush1.bf16.msra.mxu0 %v5526_v48  ;;  %3015 = vmatpush1.bf16.msra.mxu1 %v5529_v49  ;;  %v5585_v48 = vld [vmem:[%s7706_s5 + $0x30c] ss:$16 sps:$4 sm:$0xff]   ;;  %v5580_v49 = vld [vmem:[%s7706_s5 + $0x300] ss:$16 sps:$4 sm:$0xff]  }
 0x148   :  { %2943 = vmatprep.subr.bf16.mxu0 %v5534_v50  ;;  %3025 = vmatprep.subr.bf16.mxu1 %v5537_v51  ;;  %v5583_v50 = vld [vmem:[%s7706_s5 + $0x308] ss:$16 sps:$4 sm:$0xff]   ;;  %v5588_v51 = vld [vmem:[%s7706_s5 + $0x324] ss:$16 sps:$4 sm:$0xff]  }
 0x15d   :  { %v1858_v63 = vpop.f32.mrb[8].mxu0  ;;  %v1899_v0 = vpop.f32.mrb[8].mxu1 }
 0x15e   :  { %v1859_v1 = vadd.f32 %v1858_v63, %v6858_v14  ;;  %v1860_v3 = vpop.f32.mrb[9].mxu0  ;;  %v1901_v4 = vpop.f32.mrb[9].mxu1  ;;  %v5586_v63 = vld [vmem:[%s7706_s5 + $0x320] ss:$16 sps:$4 sm:$0xff]  }
 0x15f   :  { %v1861_v5 = vadd.f32 %v1860_v3, %v6866_v19  ;;  %v1862_v7 = vpop.f32.mrb[10].mxu0  ;;  %v1903_v8 = vpop.f32.mrb[10].mxu1  ;;  %v5532_v19 = vld [vmem:[%s7706_s5 + $0x200] ss:$16 sps:$4 sm:$0xff]  }
 0x160   :  { %v1900_v9 = vadd.f32 %v1899_v0, %v1859_v1  ;;  %v1863_v10 = vpop.f32.mrb[11].mxu0  ;;  %v1904_v11 = vpop.f32.mrb[11].mxu1  ;;  %v5589_v0 = vld [vmem:[%s7706_s5 + $0x328] ss:$16 sps:$4 sm:$0xff]   ;;  %v5594_v1 = vld [vmem:[%s7706_s5 + $0x344] ss:$16 sps:$4 sm:$0xff]  }
 0x161   :  { %v1902_v12 = vadd.f32 %v1901_v4, %v1861_v5  ;;  %v5592_v3 = vld [vmem:[%s7706_s5 + $0x340] ss:$16 sps:$4 sm:$0xff]   ;;  %v5595_v4 = vld [vmem:[%s7706_s5 + $0x348] ss:$16 sps:$4 sm:$0xff]   ;;  %v5600_v5 = vld [vmem:[%s7706_s5 + $0x364] ss:$16 sps:$4 sm:$0xff]  }
 0x162   :  { %v2092_v13 = vadd.f32 %v2075_v2, %v1900_v9  ;;  %v5597_v2 = vld [vmem:[%s7706_s5 + $0x34c] ss:$16 sps:$4 sm:$0xff]   ;;  %v5598_v7 = vld [vmem:[%s7706_s5 + $0x360] ss:$16 sps:$4 sm:$0xff]   ;;  %v5601_v8 = vld [vmem:[%s7706_s5 + $0x368] ss:$16 sps:$4 sm:$0xff]  }
 0x163   :  { %v2093_v15 = vadd.f32 %v2079_v6, %v1902_v12  ;;  %v5603_v6 = vld [vmem:[%s7706_s5 + $0x36c] ss:$16 sps:$4 sm:$0xff]   ;;  %v5606_v9 = vld [vmem:[%s7706_s5 + $0x384] ss:$16 sps:$4 sm:$0xff]   ;;  %v5604_v11 = vld [vmem:[%s7706_s5 + $0x380] ss:$16 sps:$4 sm:$0xff]  }
 0x164   :  { %vm2096_vm1 = vcmp.ge.f32.partialorder %v2092_v13, 0.0  ;;  %v2100_v14 = vmul.f32 0.2, %v2092_v13  ;;  %v5609_v10 = vld [vmem:[%s7706_s5 + $0x38c] ss:$16 sps:$4 sm:$0xff]  }
 0x165   :  { %v2101_v54 = vmul.f32 0.2, %v2093_v15  ;;  %vm2097_vm2 = vcmp.ge.f32.partialorder %v2093_v15, 0.0  ;;  %v5607_v12 = vld [vmem:[%s7706_s5 + $0x388] ss:$16 sps:$4 sm:$0xff]  }
 0x166   :  { %v2104_v57 = vsel %vm2096_vm1, %v2092_v13, %v2100_v14  ;;  %v5612_v13 = vld [vmem:[%s7706_s5 + $0x3a4] ss:$16 sps:$4 sm:$0xff]   ;;  %v5610_v14 = vld [vmem:[%s7706_s5 + $0x3a0] ss:$16 sps:$4 sm:$0xff]  }
 0x167   :  { %v2105_v18 = vsel %vm2097_vm2, %v2093_v15, %v2101_v54  ;;  %v2108_v22 = vpack.c.bf16 %v2104_v57, %v2104_v57  ;;  %v5615_v15 = vld [vmem:[%s7706_s5 + $0x3ac] ss:$16 sps:$4 sm:$0xff]   ;;  %v5613_v54 = vld [vmem:[%s7706_s5 + $0x3a8] ss:$16 sps:$4 sm:$0xff]  }
 0x168   :  { %v2109_v20 = vpack.c.bf16 %v2105_v18, %v2105_v18 }
 0x16a   :  { %2934 = vmatprep.mubr.bf16.mxu0 %v2109_v20  ;;  %3016 = vmatprep.mubr.bf16.mxu1 %v2109_v20  ;;  %v5618_v20 = vld [vmem:[%s7706_s5 + $0x3c4] ss:$16 sps:$4 sm:$0xff]  }
 0x16b   :  { %2935 = vmatmul.mubr.bf16.vlgmr.msra.gmra.mrb[20].mxu0 %v2108_v22  ;;  %3017 = vmatmul.mubr.bf16.vlgmr.msra.gmra.mrb[20].mxu1 %v2108_v22 }
 0x16c   :  { %2944 = vmatpush1.bf16.msra.mxu0 %v5532_v19  ;;  %3026 = vmatpush1.bf16.msra.mxu1 %v5535_v21  ;;  %v5621_v19 = vld [vmem:[%s7706_s5 + $0x3cc] ss:$16 sps:$4 sm:$0xff]  }
 0x16d   :  { %2945 = vmatprep.subr.bf16.mxu0 %v5540_v23  ;;  %3027 = vmatprep.subr.bf16.mxu1 %v5543_v24  ;;  %v5616_v24 = vld [vmem:[%s7706_s5 + $0x3c0] ss:$16 sps:$4 sm:$0xff]  }
 0x170   :  { %2946 = vmatpush1.bf16.msra.mxu0 %v5538_v25  ;;  %3028 = vmatpush1.bf16.msra.mxu1 %v5541_v28  ;;  %v5619_v25 = vld [vmem:[%s7706_s5 + $0x3c8] ss:$16 sps:$4 sm:$0xff]  }
 0x171   :  { %2947 = vmatprep.subr.bf16.mxu0 %v5546_v29  ;;  %3029 = vmatprep.subr.bf16.mxu1 %v5549_v30 }
 0x174   :  { %2948 = vmatpush1.bf16.msra.mxu0 %v5544_v31  ;;  %3030 = vmatpush1.bf16.msra.mxu1 %v5547_v32  ;;  %v5624_v31 = vld [vmem:[%s7706_s5 + $0x3e4] ss:$16 sps:$4 sm:$0xff]  }
 0x175   :  { %2949 = vmatprep.subr.bf16.mxu0 %v5552_v33  ;;  %3031 = vmatprep.subr.bf16.mxu1 %v5555_v34 }
 0x178   :  { %2950 = vmatpush1.bf16.msra.mxu0 %v5550_v35  ;;  %3032 = vmatpush1.bf16.msra.mxu1 %v5553_v36  ;;  %v5627_v35 = vld [vmem:[%s7706_s5 + $0x3ec] ss:$16 sps:$4 sm:$0xff]   ;;  %v5625_v36 = vld [vmem:[%s7706_s5 + $0x3e8] ss:$16 sps:$4 sm:$0xff]  }
 0x179   :  { %2951 = vmatprep.subr.bf16.mxu0 %v5558_v37  ;;  %3033 = vmatprep.subr.bf16.mxu1 %v5561_v38  ;;  %v5630_v37 = vld [vmem:[%s7708_s7 + $0x4] ss:$16 sps:$4 sm:$0xff]   ;;  %v5633_v38 = vld [vmem:[%s7708_s7 + $0xc] ss:$16 sps:$4 sm:$0xff]  }
 0x17c   :  { %2952 = vmatpush1.bf16.msra.mxu0 %v5556_v58  ;;  %3034 = vmatpush1.bf16.msra.mxu1 %v5559_v59  ;;  %v7190_v58 = vsub.s32 2, %v6976_v53  ;;  %v7193_v59 = vsub.s32 3, %v6976_v53 }
 0x17d   :  { %2953 = vmatprep.subr.bf16.mxu0 %v5564_v16  ;;  %3035 = vmatprep.subr.bf16.mxu1 %v5567_v17 }
 0x180   :  { %2954 = vmatpush1.bf16.msra.mxu0 %v5562_v39  ;;  %3036 = vmatpush1.bf16.msra.mxu1 %v5565_v40  ;;  %v2083_v40 = vrot.slane %v6984_v61, %v7190_v58 }
 0x181   :  { %2955 = vmatprep.subr.bf16.mxu0 %v5570_v41  ;;  %3037 = vmatprep.subr.bf16.mxu1 %v5573_v45 }
 0x184   :  { %2956 = vmatpush1.bf16.msra.mxu0 %v5568_v42  ;;  %3038 = vmatpush1.bf16.msra.mxu1 %v5571_v43  ;;  %v2087_v43 = vrot.slane %v6984_v61, %v7193_v59  ;;  %v5631_v61 = vld [vmem:[%s7708_s7 + $0x8] ss:$16 sps:$4 sm:$0xff]  }
 0x185   :  { %2957 = vmatprep.subr.bf16.mxu0 %v5576_v44  ;;  %3039 = vmatprep.subr.bf16.mxu1 %v5579_v46 }
 0x188   :  { %2958 = vmatpush1.bf16.msra.mxu0 %v5574_v26  ;;  %3040 = vmatpush1.bf16.msra.mxu1 %v5577_v27 }
 0x189   :  { %2959 = vmatprep.subr.bf16.mxu0 %v5582_v47  ;;  %3041 = vmatprep.subr.bf16.mxu1 %v5585_v48 }
 0x18c   :  { %2960 = vmatpush1.bf16.msra.mxu0 %v5580_v49  ;;  %3042 = vmatpush1.bf16.msra.mxu1 %v5583_v50 }
 0x18d   :  { %2961 = vmatprep.subr.bf16.mxu0 %v5588_v51  ;;  %3043 = vmatprep.subr.bf16.mxu1 %v5591_v52 }
 0x190   :  { %2962 = vmatpush1.bf16.msra.mxu0 %v5586_v63  ;;  %3044 = vmatpush1.bf16.msra.mxu1 %v5589_v0 }
 0x191   :  { %2963 = vmatprep.subr.bf16.mxu0 %v5594_v1  ;;  %3045 = vmatprep.subr.bf16.mxu1 %v5597_v2  ;;  %v5628_v1 = vld [vmem:[%s7708_s7] ss:$16 sps:$4 sm:$0xff]  }
 0x194   :  { %2964 = vmatpush1.bf16.msra.mxu0 %v5592_v3  ;;  %3046 = vmatpush1.bf16.msra.mxu1 %v5595_v4  ;;  %v5636_v3 = vld [vmem:[%s7708_s7 + $0x24] ss:$16 sps:$4 sm:$0xff]   ;;  %v5639_v4 = vld [vmem:[%s7708_s7 + $0x2c] ss:$16 sps:$4 sm:$0xff]  }
 0x195   :  { %2965 = vmatprep.subr.bf16.mxu0 %v5600_v5  ;;  %3047 = vmatprep.subr.bf16.mxu1 %v5603_v6  ;;  %v5634_v5 = vld [vmem:[%s7708_s7 + $0x20] ss:$16 sps:$4 sm:$0xff]   ;;  %v5637_v6 = vld [vmem:[%s7708_s7 + $0x28] ss:$16 sps:$4 sm:$0xff]  }
 0x198   :  { %2966 = vmatpush1.bf16.msra.mxu0 %v5598_v7  ;;  %3048 = vmatpush1.bf16.msra.mxu1 %v5601_v8  ;;  %v5642_v7 = vld [vmem:[%s7708_s7 + $0x44] ss:$16 sps:$4 sm:$0xff]   ;;  %v5645_v8 = vld [vmem:[%s7708_s7 + $0x4c] ss:$16 sps:$4 sm:$0xff]  }
 0x199   :  { %2967 = vmatprep.subr.bf16.mxu0 %v5606_v9  ;;  %3049 = vmatprep.subr.bf16.mxu1 %v5609_v10  ;;  %v5640_v9 = vld [vmem:[%s7708_s7 + $0x40] ss:$16 sps:$4 sm:$0xff]   ;;  %v5643_v10 = vld [vmem:[%s7708_s7 + $0x48] ss:$16 sps:$4 sm:$0xff]  }
 0x19c   :  { %2968 = vmatpush1.bf16.msra.mxu0 %v5604_v11  ;;  %3050 = vmatpush1.bf16.msra.mxu1 %v5607_v12  ;;  %v5648_v11 = vld [vmem:[%s7708_s7 + $0x64] ss:$16 sps:$4 sm:$0xff]   ;;  %v5651_v12 = vld [vmem:[%s7708_s7 + $0x6c] ss:$16 sps:$4 sm:$0xff]  }
 0x19d   :  { %v1940_v57 = vpop.f32.mrb[12].mxu0  ;;  %v1981_v18 = vpop.f32.mrb[12].mxu1  ;;  %2969 = vmatprep.subr.bf16.mxu0 %v5612_v13  ;;  %3051 = vmatprep.subr.bf16.mxu1 %v5615_v15  ;;  %v5646_v13 = vld [vmem:[%s7708_s7 + $0x60] ss:$16 sps:$4 sm:$0xff]   ;;  %v5649_v15 = vld [vmem:[%s7708_s7 + $0x68] ss:$16 sps:$4 sm:$0xff]  }
 0x19e   :  { %v1941_v21 = vadd.f32 %v1940_v57, %v6650_v55  ;;  %v1942_v22 = vpop.f32.mrb[13].mxu0  ;;  %v1983_v23 = vpop.f32.mrb[13].mxu1  ;;  %v5652_v57 = vld [vmem:[%s7708_s7 + $0x80] ss:$16 sps:$4 sm:$0xff]  }
 0x19f   :  { %v1943_v28 = vadd.f32 %v1942_v22, %v6657_v60  ;;  %v1944_v29 = vpop.f32.mrb[14].mxu0  ;;  %v1985_v30 = vpop.f32.mrb[14].mxu1  ;;  %v5622_v60 = vld [vmem:[%s7706_s5 + $0x3e0] ss:$16 sps:$4 sm:$0xff]   ;;  %v5661_v22 = vld [vmem:[%s7708_s7 + $0xa8] ss:$16 sps:$4 sm:$0xff]  }
 0x1a0   :  { %v1982_v32 = vadd.f32 %v1981_v18, %v1941_v21  ;;  %v1945_v55 = vpop.f32.mrb[15].mxu0  ;;  %v1986_v33 = vpop.f32.mrb[15].mxu1  ;;  %2970 = vmatpush1.bf16.msra.mxu0 %v5610_v14  ;;  %3052 = vmatpush1.bf16.msra.mxu1 %v5613_v54  ;;  %v5654_v14 = vld [vmem:[%s7708_s7 + $0x84] ss:$16 sps:$4 sm:$0xff]   ;;  %v5657_v54 = vld [vmem:[%s7708_s7 + $0x8c] ss:$16 sps:$4 sm:$0xff]  }
 0x1a1   :  { %v1984_v34 = vadd.f32 %v1983_v23, %v1943_v28  ;;  %2971 = vmatprep.subr.bf16.mxu0 %v5618_v20  ;;  %3053 = vmatprep.subr.bf16.mxu1 %v5621_v19  ;;  %v5655_v18 = vld [vmem:[%s7708_s7 + $0x88] ss:$16 sps:$4 sm:$0xff]   ;;  %v5660_v20 = vld [vmem:[%s7708_s7 + $0xa4] ss:$16 sps:$4 sm:$0xff]   ;;  %v5663_v19 = vld [vmem:[%s7708_s7 + $0xac] ss:$16 sps:$4 sm:$0xff]  }
 0x1a2   :  { %v5658_v21 = vld [vmem:[%s7708_s7 + $0xa0] ss:$16 sps:$4 sm:$0xff]   ;;  %v5666_v23 = vld [vmem:[%s7708_s7 + $0xc4] ss:$16 sps:$4 sm:$0xff]   ;;  %v5667_v28 = vld [vmem:[%s7708_s7 + $0xc8] ss:$16 sps:$4 sm:$0xff]  }
 0x1a3   :  { %v5672_v29 = vld [vmem:[%s7708_s7 + $0xe4] ss:$16 sps:$4 sm:$0xff]   ;;  %v5675_v30 = vld [vmem:[%s7708_s7 + $0xec] ss:$16 sps:$4 sm:$0xff]  }
 0x1a4   :  { %2972 = vmatpush1.bf16.msra.mxu0 %v5616_v24  ;;  %3054 = vmatpush1.bf16.msra.mxu1 %v5619_v25  ;;  %v5669_v24 = vld [vmem:[%s7708_s7 + $0xcc] ss:$16 sps:$4 sm:$0xff]   ;;  %v5664_v25 = vld [vmem:[%s7708_s7 + $0xc0] ss:$16 sps:$4 sm:$0xff]   ;;  %v5678_v55 = vld [vmem:[%s7708_s7 + $0x104] ss:$16 sps:$4 sm:$0xff]  }
 0x1a5   :  { %2973 = vmatprep.subr.bf16.mxu0 %v5624_v31  ;;  %3055 = vmatprep.subr.bf16.mxu1 %v5627_v35  ;;  %v5670_v31 = vld [vmem:[%s7708_s7 + $0xe0] ss:$16 sps:$4 sm:$0xff]   ;;  %v5681_v33 = vld [vmem:[%s7708_s7 + $0x10c] ss:$16 sps:$4 sm:$0xff]   ;;  %v5679_v35 = vld [vmem:[%s7708_s7 + $0x108] ss:$16 sps:$4 sm:$0xff]  }
 0x1a8   :  { %2974 = vmatpush1.bf16.msra.mxu0 %v5622_v60  ;;  %3056 = vmatpush1.bf16.msra.mxu1 %v5625_v36  ;;  %v5684_v60 = vld [vmem:[%s7708_s7 + $0x124] ss:$16 sps:$4 sm:$0xff]   ;;  %v5687_v36 = vld [vmem:[%s7708_s7 + $0x12c] ss:$16 sps:$4 sm:$0xff]  }
 0x1a9   :  { %3872 = vmatprep.subr.bf16.mxu0 %v5630_v37  ;;  %3954 = vmatprep.subr.bf16.mxu1 %v5633_v38  ;;  %v5682_v37 = vld [vmem:[%s7708_s7 + $0x120] ss:$16 sps:$4 sm:$0xff]   ;;  %v5685_v38 = vld [vmem:[%s7708_s7 + $0x128] ss:$16 sps:$4 sm:$0xff]  }
 0x1dd   :  { %v2022_v16 = vpop.f32.mrb[16].mxu0  ;;  %v2063_v17 = vpop.f32.mrb[16].mxu1 }
 0x1de   :  { %v2023_v39 = vadd.f32 %v2022_v16, %v1982_v32  ;;  %v2024_v41 = vpop.f32.mrb[17].mxu0  ;;  %v2065_v45 = vpop.f32.mrb[17].mxu1  ;;  %v5673_v32 = vld [vmem:[%s7708_s7 + $0xe8] ss:$16 sps:$4 sm:$0xff]   ;;  %v5690_v16 = vld [vmem:[%s7708_s7 + $0x144] ss:$16 sps:$4 sm:$0xff]  }
 0x1df   :  { %v2025_v42 = vadd.f32 %v2024_v41, %v1984_v34  ;;  %v2026_v44 = vpop.f32.mrb[18].mxu0  ;;  %v2067_v46 = vpop.f32.mrb[18].mxu1  ;;  %v5676_v34 = vld [vmem:[%s7708_s7 + $0x100] ss:$16 sps:$4 sm:$0xff]   ;;  %v5696_v41 = vld [vmem:[%s7708_s7 + $0x164] ss:$16 sps:$4 sm:$0xff]  }
 0x1e0   :  { %v2064_v26 = vadd.f32 %v2063_v17, %v2023_v39  ;;  %v2027_v27 = vpop.f32.mrb[19].mxu0  ;;  %v2068_v47 = vpop.f32.mrb[19].mxu1  ;;  %v5693_v17 = vld [vmem:[%s7708_s7 + $0x14c] ss:$16 sps:$4 sm:$0xff]   ;;  %v5688_v39 = vld [vmem:[%s7708_s7 + $0x140] ss:$16 sps:$4 sm:$0xff]  }
 0x1e1   :  { %v2066_v48 = vadd.f32 %v2065_v45, %v2025_v42  ;;  %v5699_v45 = vld [vmem:[%s7708_s7 + $0x16c] ss:$16 sps:$4 sm:$0xff]   ;;  %v5694_v42 = vld [vmem:[%s7708_s7 + $0x160] ss:$16 sps:$4 sm:$0xff]   ;;  %v5702_v44 = vld [vmem:[%s7708_s7 + $0x184] ss:$16 sps:$4 sm:$0xff]  }
 0x1e2   :  { %v2094_v53 = vadd.f32 %v2083_v40, %v2064_v26  ;;  %v5691_v40 = vld [vmem:[%s7708_s7 + $0x148] ss:$16 sps:$4 sm:$0xff]   ;;  %v5705_v46 = vld [vmem:[%s7708_s7 + $0x18c] ss:$16 sps:$4 sm:$0xff]   ;;  %v5700_v26 = vld [vmem:[%s7708_s7 + $0x180] ss:$16 sps:$4 sm:$0xff]  }
 0x1e3   :  { %v2095_v49 = vadd.f32 %v2087_v43, %v2066_v48  ;;  %v5697_v43 = vld [vmem:[%s7708_s7 + $0x168] ss:$16 sps:$4 sm:$0xff]   ;;  %v5708_v47 = vld [vmem:[%s7708_s7 + $0x1a4] ss:$16 sps:$4 sm:$0xff]   ;;  %v5711_v48 = vld [vmem:[%s7708_s7 + $0x1ac] ss:$16 sps:$4 sm:$0xff]  }
 0x1e4   :  { %vm2098_vm3 = vcmp.ge.f32.partialorder %v2094_v53, 0.0  ;;  %v2102_v50 = vmul.f32 0.2, %v2094_v53  ;;  %v5703_v27 = vld [vmem:[%s7708_s7 + $0x188] ss:$16 sps:$4 sm:$0xff]  }
 0x1e5   :  { %v2103_v51 = vmul.f32 0.2, %v2095_v49  ;;  %vm2099_vm4 = vcmp.ge.f32.partialorder %v2095_v49, 0.0 }
 0x1e6   :  { %v2106_v52 = vsel %vm2098_vm3, %v2094_v53, %v2102_v50  ;;  %v5706_v53 = vld [vmem:[%s7708_s7 + $0x1a0] ss:$16 sps:$4 sm:$0xff]   ;;  %v5714_v50 = vld [vmem:[%s7708_s7 + $0x1c4] ss:$16 sps:$4 sm:$0xff]  }
 0x1e7   :  { %v2107_v63 = vsel %vm2099_vm4, %v2095_v49, %v2103_v51  ;;  %v2110_v2 = vpack.c.bf16 %v2106_v52, %v2106_v52  ;;  %v5709_v49 = vld [vmem:[%s7708_s7 + $0x1a8] ss:$16 sps:$4 sm:$0xff]   ;;  %v5717_v51 = vld [vmem:[%s7708_s7 + $0x1cc] ss:$16 sps:$4 sm:$0xff]   ;;  %v5712_v52 = vld [vmem:[%s7708_s7 + $0x1c0] ss:$16 sps:$4 sm:$0xff]  }
 0x1e8   :  { %v2111_v0 = vpack.c.bf16 %v2107_v63, %v2107_v63  ;;  %v5715_v63 = vld [vmem:[%s7708_s7 + $0x1c8] ss:$16 sps:$4 sm:$0xff]  }
 0x1ea   :  { %2975 = vmatprep.mubr.bf16.mxu0 %v2111_v0  ;;  %3057 = vmatprep.mubr.bf16.mxu1 %v2111_v0  ;;  %v5720_v0 = vld [vmem:[%s7708_s7 + $0x1e4] ss:$16 sps:$4 sm:$0xff]  }
 0x1eb   :  { %2976 = vmatmul.mubr.bf16.vlgmr.msra.gmra.mrb[20].mxu0 %v2110_v2  ;;  %3058 = vmatmul.mubr.bf16.vlgmr.msra.gmra.mrb[20].mxu1 %v2110_v2  ;;  %v5721_v2 = vld [vmem:[%s7708_s7 + $0x1e8] ss:$16 sps:$4 sm:$0xff]  }
 0x1ec   :  { %3873 = vmatpush1.bf16.msra.mxu0 %v5628_v1  ;;  %3955 = vmatpush1.bf16.msra.mxu1 %v5631_v61  ;;  %v5723_v1 = vld [vmem:[%s7708_s7 + $0x1ec] ss:$16 sps:$4 sm:$0xff]   ;;  %v5718_v61 = vld [vmem:[%s7708_s7 + $0x1e0] ss:$16 sps:$4 sm:$0xff]  }
 0x1ed   :  { %3874 = vmatprep.subr.bf16.mxu0 %v5636_v3  ;;  %3956 = vmatprep.subr.bf16.mxu1 %v5639_v4  ;;  %v5726_v3 = vld [vmem:[%s7708_s7 + $0x204] ss:$16 sps:$4 sm:$0xff]   ;;  %v5729_v4 = vld [vmem:[%s7708_s7 + $0x20c] ss:$16 sps:$4 sm:$0xff]  }
 0x1f0   :  { %3875 = vmatpush1.bf16.msra.mxu0 %v5634_v5  ;;  %3957 = vmatpush1.bf16.msra.mxu1 %v5637_v6  ;;  %v7394_v5 = vld [vmem:[%s7710_s6] sm:$0xf] }
 0x1f1   :  { %3876 = vmatprep.subr.bf16.mxu0 %v5642_v7  ;;  %3958 = vmatprep.subr.bf16.mxu1 %v5645_v8  ;;  %v2245_v6 = vrot.slane %v7394_v5, %v6979_v56  ;;  %v2249_v7 = vrot.slane %v7394_v5, %v6987_v62  ;;  %v2257_v8 = vrot.slane %v7394_v5, %v7193_v59 }
 0x1f4   :  { %3877 = vmatpush1.bf16.msra.mxu0 %v5640_v9  ;;  %3959 = vmatpush1.bf16.msra.mxu1 %v5643_v10 }
 0x1f5   :  { %3878 = vmatprep.subr.bf16.mxu0 %v5648_v11  ;;  %3960 = vmatprep.subr.bf16.mxu1 %v5651_v12 }
 0x1f8   :  { %3879 = vmatpush1.bf16.msra.mxu0 %v5646_v13  ;;  %3961 = vmatpush1.bf16.msra.mxu1 %v5649_v15 }
 0x1f9   :  { %3880 = vmatprep.subr.bf16.mxu0 %v5654_v14  ;;  %3962 = vmatprep.subr.bf16.mxu1 %v5657_v54 }
 0x1fc   :  { %3881 = vmatpush1.bf16.msra.mxu0 %v5652_v57  ;;  %3963 = vmatpush1.bf16.msra.mxu1 %v5655_v18 }
 0x1fd   :  { %3882 = vmatprep.subr.bf16.mxu0 %v5660_v20  ;;  %3964 = vmatprep.subr.bf16.mxu1 %v5663_v19 }
 0x200   :  { %3883 = vmatpush1.bf16.msra.mxu0 %v5658_v21  ;;  %3965 = vmatpush1.bf16.msra.mxu1 %v5661_v22 }
 0x201   :  { %3884 = vmatprep.subr.bf16.mxu0 %v5666_v23  ;;  %3966 = vmatprep.subr.bf16.mxu1 %v5669_v24 }
 0x204   :  { %3885 = vmatpush1.bf16.msra.mxu0 %v5664_v25  ;;  %3967 = vmatpush1.bf16.msra.mxu1 %v5667_v28  ;;  %v5724_v28 = vld [vmem:[%s7708_s7 + $0x200] ss:$16 sps:$4 sm:$0xff]  }
 0x205   :  { %3886 = vmatprep.subr.bf16.mxu0 %v5672_v29  ;;  %3968 = vmatprep.subr.bf16.mxu1 %v5675_v30  ;;  %v5727_v29 = vld [vmem:[%s7708_s7 + $0x208] ss:$16 sps:$4 sm:$0xff]  }
 0x208   :  { %3887 = vmatpush1.bf16.msra.mxu0 %v5670_v31  ;;  %3969 = vmatpush1.bf16.msra.mxu1 %v5673_v32  ;;  %v5732_v32 = vld [vmem:[%s7708_s7 + $0x224] ss:$16 sps:$4 sm:$0xff]  }
 0x209   :  { %3888 = vmatprep.subr.bf16.mxu0 %v5678_v55  ;;  %3970 = vmatprep.subr.bf16.mxu1 %v5681_v33  ;;  %v5735_v55 = vld [vmem:[%s7708_s7 + $0x22c] ss:$16 sps:$4 sm:$0xff]  }
 0x20c   :  { %3889 = vmatpush1.bf16.msra.mxu0 %v5676_v34  ;;  %3971 = vmatpush1.bf16.msra.mxu1 %v5679_v35  ;;  %v5730_v34 = vld [vmem:[%s7708_s7 + $0x220] ss:$16 sps:$4 sm:$0xff]   ;;  %v5733_v35 = vld [vmem:[%s7708_s7 + $0x228] ss:$16 sps:$4 sm:$0xff]  }
 0x20d   :  { %3890 = vmatprep.subr.bf16.mxu0 %v5684_v60  ;;  %3972 = vmatprep.subr.bf16.mxu1 %v5687_v36  ;;  %v5738_v60 = vld [vmem:[%s7708_s7 + $0x244] ss:$16 sps:$4 sm:$0xff]   ;;  %v5741_v36 = vld [vmem:[%s7708_s7 + $0x24c] ss:$16 sps:$4 sm:$0xff]  }
 0x210   :  { %3891 = vmatpush1.bf16.msra.mxu0 %v5682_v37  ;;  %3973 = vmatpush1.bf16.msra.mxu1 %v5685_v38  ;;  %v5736_v37 = vld [vmem:[%s7708_s7 + $0x240] ss:$16 sps:$4 sm:$0xff]   ;;  %v5739_v38 = vld [vmem:[%s7708_s7 + $0x248] ss:$16 sps:$4 sm:$0xff]  }
 0x211   :  { %3892 = vmatprep.subr.bf16.mxu0 %v5690_v16  ;;  %3974 = vmatprep.subr.bf16.mxu1 %v5693_v17  ;;  %v5744_v16 = vld [vmem:[%s7708_s7 + $0x264] ss:$16 sps:$4 sm:$0xff]   ;;  %v5747_v17 = vld [vmem:[%s7708_s7 + $0x26c] ss:$16 sps:$4 sm:$0xff]  }
 0x214   :  { %3893 = vmatpush1.bf16.msra.mxu0 %v5688_v39  ;;  %3975 = vmatpush1.bf16.msra.mxu1 %v5691_v40  ;;  %v5742_v39 = vld [vmem:[%s7708_s7 + $0x260] ss:$16 sps:$4 sm:$0xff]   ;;  %v5745_v40 = vld [vmem:[%s7708_s7 + $0x268] ss:$16 sps:$4 sm:$0xff]  }
 0x215   :  { %3894 = vmatprep.subr.bf16.mxu0 %v5696_v41  ;;  %3976 = vmatprep.subr.bf16.mxu1 %v5699_v45  ;;  %v5750_v41 = vld [vmem:[%s7708_s7 + $0x284] ss:$16 sps:$4 sm:$0xff]   ;;  %v5753_v45 = vld [vmem:[%s7708_s7 + $0x28c] ss:$16 sps:$4 sm:$0xff]  }
 0x218   :  { %3895 = vmatpush1.bf16.msra.mxu0 %v5694_v42  ;;  %3977 = vmatpush1.bf16.msra.mxu1 %v5697_v43  ;;  %v5748_v42 = vld [vmem:[%s7708_s7 + $0x280] ss:$16 sps:$4 sm:$0xff]   ;;  %v5751_v43 = vld [vmem:[%s7708_s7 + $0x288] ss:$16 sps:$4 sm:$0xff]  }
 0x219   :  { %3896 = vmatprep.subr.bf16.mxu0 %v5702_v44  ;;  %3978 = vmatprep.subr.bf16.mxu1 %v5705_v46  ;;  %v5756_v44 = vld [vmem:[%s7708_s7 + $0x2a4] ss:$16 sps:$4 sm:$0xff]   ;;  %v5759_v46 = vld [vmem:[%s7708_s7 + $0x2ac] ss:$16 sps:$4 sm:$0xff]  }
 0x21c   :  { %3897 = vmatpush1.bf16.msra.mxu0 %v5700_v26  ;;  %3979 = vmatpush1.bf16.msra.mxu1 %v5703_v27  ;;  %v5754_v26 = vld [vmem:[%s7708_s7 + $0x2a0] ss:$16 sps:$4 sm:$0xff]   ;;  %v5757_v27 = vld [vmem:[%s7708_s7 + $0x2a8] ss:$16 sps:$4 sm:$0xff]  }
 0x21d   :  { %3898 = vmatprep.subr.bf16.mxu0 %v5708_v47  ;;  %3980 = vmatprep.subr.bf16.mxu1 %v5711_v48  ;;  %v5762_v47 = vld [vmem:[%s7708_s7 + $0x2c4] ss:$16 sps:$4 sm:$0xff]   ;;  %v5765_v48 = vld [vmem:[%s7708_s7 + $0x2cc] ss:$16 sps:$4 sm:$0xff]  }
 0x220   :  { %3899 = vmatpush1.bf16.msra.mxu0 %v5706_v53  ;;  %3981 = vmatpush1.bf16.msra.mxu1 %v5709_v49  ;;  %v5760_v53 = vld [vmem:[%s7708_s7 + $0x2c0] ss:$16 sps:$4 sm:$0xff]   ;;  %v5763_v49 = vld [vmem:[%s7708_s7 + $0x2c8] ss:$16 sps:$4 sm:$0xff]  }
 0x221   :  { %3900 = vmatprep.subr.bf16.mxu0 %v5714_v50  ;;  %3982 = vmatprep.subr.bf16.mxu1 %v5717_v51  ;;  %v5768_v50 = vld [vmem:[%s7708_s7 + $0x2e4] ss:$16 sps:$4 sm:$0xff]   ;;  %v5771_v51 = vld [vmem:[%s7708_s7 + $0x2ec] ss:$16 sps:$4 sm:$0xff]  }
 0x224   :  { %3901 = vmatpush1.bf16.msra.mxu0 %v5712_v52  ;;  %3983 = vmatpush1.bf16.msra.mxu1 %v5715_v63  ;;  %v5766_v52 = vld [vmem:[%s7708_s7 + $0x2e0] ss:$16 sps:$4 sm:$0xff]   ;;  %v5769_v63 = vld [vmem:[%s7708_s7 + $0x2e8] ss:$16 sps:$4 sm:$0xff]  }
 0x225   :  { %3902 = vmatprep.subr.bf16.mxu0 %v5720_v0  ;;  %3984 = vmatprep.subr.bf16.mxu1 %v5723_v1  ;;  %v5774_v0 = vld [vmem:[%s7708_s7 + $0x304] ss:$16 sps:$4 sm:$0xff]   ;;  %v5777_v1 = vld [vmem:[%s7708_s7 + $0x30c] ss:$16 sps:$4 sm:$0xff]  }
 0x228   :  { %3903 = vmatpush1.bf16.msra.mxu0 %v5718_v61  ;;  %3985 = vmatpush1.bf16.msra.mxu1 %v5721_v2  ;;  %v5772_v61 = vld [vmem:[%s7708_s7 + $0x300] ss:$16 sps:$4 sm:$0xff]   ;;  %v5775_v2 = vld [vmem:[%s7708_s7 + $0x308] ss:$16 sps:$4 sm:$0xff]  }
 0x229   :  { %3913 = vmatprep.subr.bf16.mxu0 %v5726_v3  ;;  %3995 = vmatprep.subr.bf16.mxu1 %v5729_v4  ;;  %v5780_v3 = vld [vmem:[%s7708_s7 + $0x324] ss:$16 sps:$4 sm:$0xff]   ;;  %v5783_v4 = vld [vmem:[%s7708_s7 + $0x32c] ss:$16 sps:$4 sm:$0xff]  }
 0x2be   :  { %v2977_v9 = vpop.f32.mrb[20].mxu0  ;;  %v7402_v10 = vpop.f32.mrb[20].mxu1 }
 0x2bf   :  { %v5007_v11 = vadd.f32 %v2977_v9, %v2245_v6  ;;  %v2979_v12 = vpop.f32.mrb[21].mxu0  ;;  %v3061_v13 = vpop.f32.mrb[21].mxu1  ;;  %v5778_v6 = vld [vmem:[%s7708_s7 + $0x320] ss:$16 sps:$4 sm:$0xff]   ;;  %v5789_v9 = vld [vmem:[%s7708_s7 + $0x34c] ss:$16 sps:$4 sm:$0xff]  }
 0x2c0   :  { %v5008_v15 = vadd.f32 %v2979_v12, %v2249_v7  ;;  %v5010_v14 = vadd.f32 %v3061_v13, %v2257_v8  ;;  %v2981_v54 = vpop.f32.mrb[22].mxu0  ;;  %v3063_v57 = vpop.f32.mrb[22].mxu1  ;;  %v5781_v7 = vld [vmem:[%s7708_s7 + $0x328] ss:$16 sps:$4 sm:$0xff]   ;;  %v5786_v8 = vld [vmem:[%s7708_s7 + $0x344] ss:$16 sps:$4 sm:$0xff]  }
 0x2c1   :  { %vm3066_vm5 = vcmp.ge.f32.partialorder %v5007_v11, 0.0  ;;  %v3070_v18 = vmul.f32 0.2, %v5007_v11  ;;  %v2982_v22 = vpop.f32.mrb[23].mxu0  ;;  %v3064_v23 = vpop.f32.mrb[23].mxu1 }
 0x2c2   :  { %vm3067_vm6 = vcmp.ge.f32.partialorder %v5008_v15, 0.0  ;;  %v3071_v20 = vmul.f32 0.2, %v5008_v15  ;;  %vm3069_vm7 = vcmp.ge.f32.partialorder %v5010_v14, 0.0  ;;  %v3073_v19 = vmul.f32 0.2, %v5010_v14 }
 0x2c3   :  { %v3074_v21 = vsel %vm3066_vm5, %v5007_v11, %v3070_v18  ;;  %v5784_v11 = vld [vmem:[%s7708_s7 + $0x340] ss:$16 sps:$4 sm:$0xff]   ;;  %v5787_v12 = vld [vmem:[%s7708_s7 + $0x348] ss:$16 sps:$4 sm:$0xff]   ;;  %v5792_v13 = vld [vmem:[%s7708_s7 + $0x364] ss:$16 sps:$4 sm:$0xff]   ;;  %v2253_v23 = vrot.slane %v7394_v5, %v7190_v58 }
 0x2c4   :  { %v3075_v24 = vsel %vm3067_vm6, %v5008_v15, %v3071_v20  ;;  %v3077_v30 = vsel %vm3069_vm7, %v5010_v14, %v3073_v19  ;;  %v3078_v31 = vpack.c.bf16 %v3074_v21, %v3074_v21  ;;  %v5795_v15 = vld [vmem:[%s7708_s7 + $0x36c] ss:$16 sps:$4 sm:$0xff]   ;;  %v5790_v14 = vld [vmem:[%s7708_s7 + $0x360] ss:$16 sps:$4 sm:$0xff]   ;;  %v5793_v54 = vld [vmem:[%s7708_s7 + $0x368] ss:$16 sps:$4 sm:$0xff]  }
 0x2c5   :  { %v3079_v25 = vpack.c.bf16 %v3075_v24, %v3075_v24  ;;  %v3081_v33 = vpack.c.bf16 %v3077_v30, %v3077_v30  ;;  %v5798_v57 = vld [vmem:[%s7708_s7 + $0x384] ss:$16 sps:$4 sm:$0xff]   ;;  %v5801_v18 = vld [vmem:[%s7708_s7 + $0x38c] ss:$16 sps:$4 sm:$0xff]   ;;  %v5796_v20 = vld [vmem:[%s7708_s7 + $0x380] ss:$16 sps:$4 sm:$0xff]  }
 0x2c6   :  { %v5799_v19 = vld [vmem:[%s7708_s7 + $0x388] ss:$16 sps:$4 sm:$0xff]   ;;  %v5804_v21 = vld [vmem:[%s7708_s7 + $0x3a4] ss:$16 sps:$4 sm:$0xff]   ;;  %v5807_v22 = vld [vmem:[%s7708_s7 + $0x3ac] ss:$16 sps:$4 sm:$0xff]  }
 0x2c7   :  { %3904 = vmatprep.mubr.bf16.mxu0 %v3079_v25  ;;  %3986 = vmatprep.mubr.bf16.mxu1 %v3079_v25  ;;  %v5802_v24 = vld [vmem:[%s7708_s7 + $0x3a0] ss:$16 sps:$4 sm:$0xff]   ;;  %v5805_v25 = vld [vmem:[%s7708_s7 + $0x3a8] ss:$16 sps:$4 sm:$0xff]   ;;  %v5813_v5 = vld [vmem:[%s7708_s7 + $0x3cc] ss:$16 sps:$4 sm:$0xff]  }
 0x2c8   :  { %3905 = vmatmul.mubr.bf16.vlgmr.msra.gmra.mrb[24].mxu0 %v3078_v31  ;;  %3987 = vmatmul.mubr.bf16.vlgmr.msra.gmra.mrb[24].mxu1 %v3078_v31  ;;  %v5808_v30 = vld [vmem:[%s7708_s7 + $0x3c0] ss:$16 sps:$4 sm:$0xff]   ;;  %v5811_v31 = vld [vmem:[%s7708_s7 + $0x3c8] ss:$16 sps:$4 sm:$0xff]  }
 0x2c9   :  { %3914 = vmatpush1.bf16.msra.mxu0 %v5724_v28  ;;  %3996 = vmatpush1.bf16.msra.mxu1 %v5727_v29  ;;  %v5810_v28 = vld [vmem:[%s7708_s7 + $0x3c4] ss:$16 sps:$4 sm:$0xff]   ;;  %v5009_v29 = vadd.f32 %v7402_v10, %v2253_v23  ;;  %v5819_v10 = vld [vmem:[%s7708_s7 + $0x3ec] ss:$16 sps:$4 sm:$0xff]  }
 0x2ca   :  { %3945 = vmatprep.mubr.bf16.mxu0 %v3081_v33  ;;  %4027 = vmatprep.mubr.bf16.mxu1 %v3081_v33  ;;  %v5814_v33 = vld [vmem:[%s7708_s7 + $0x3e0] ss:$16 sps:$4 sm:$0xff]  }
 0x2cb   :  { %3915 = vmatprep.subr.bf16.mxu0 %v5732_v32  ;;  %3997 = vmatprep.subr.bf16.mxu1 %v5735_v55  ;;  %v5816_v32 = vld [vmem:[%s7708_s7 + $0x3e4] ss:$16 sps:$4 sm:$0xff]   ;;  %v3072_v55 = vmul.f32 0.2, %v5009_v29  ;;  %vm3068_vm8 = vcmp.ge.f32.partialorder %v5009_v29, 0.0 }
 0x2cd   :  { %3916 = vmatpush1.bf16.msra.mxu0 %v5730_v34  ;;  %3998 = vmatpush1.bf16.msra.mxu1 %v5733_v35  ;;  %v5817_v34 = vld [vmem:[%s7708_s7 + $0x3e8] ss:$16 sps:$4 sm:$0xff]   ;;  %v5820_v35 = vld [vmem:[%s7709_s9 + $0x40] sm:$0xff]  }
 0x2ce   :  { %3917 = vmatprep.subr.bf16.mxu0 %v5738_v60  ;;  %3999 = vmatprep.subr.bf16.mxu1 %v5741_v36  ;;  %v5821_v60 = vld [vmem:[%s7709_s9 + $0xc0] sm:$0xff]   ;;  %v3076_v36 = vsel %vm3068_vm8, %v5009_v29, %v3072_v55 }
 0x2d1   :  { %3918 = vmatpush1.bf16.msra.mxu0 %v5736_v37  ;;  %4000 = vmatpush1.bf16.msra.mxu1 %v5739_v38  ;;  %v5822_v37 = vld [vmem:[%s7709_s9] sm:$0xff]  }
 0x2d2   :  { %3919 = vmatprep.subr.bf16.mxu0 %v5744_v16  ;;  %4001 = vmatprep.subr.bf16.mxu1 %v5747_v17  ;;  %v5823_v38 = vld [vmem:[%s7709_s9 + $0x80] sm:$0xff]   ;;  %v3080_v16 = vpack.c.bf16 %v3076_v36, %v3076_v36  ;;  %v5824_v17 = vld [vmem:[%s7709_s9 + $0x48] sm:$0xff]  }
 0x2d5   :  { %3920 = vmatpush1.bf16.msra.mxu0 %v5742_v39  ;;  %4002 = vmatpush1.bf16.msra.mxu1 %v5745_v40  ;;  %v5825_v39 = vld [vmem:[%s7709_s9 + $0xc8] sm:$0xff]  }
 0x2d6   :  { %3921 = vmatprep.subr.bf16.mxu0 %v5750_v41  ;;  %4003 = vmatprep.subr.bf16.mxu1 %v5753_v45  ;;  %v5826_v40 = vld [vmem:[%s7709_s9 + $0x8] sm:$0xff]   ;;  %v5828_v45 = vld [vmem:[%s7709_s9 + $0x50] sm:$0xff]  }
 0x2d7   :  { %v5827_v41 = vld [vmem:[%s7709_s9 + $0x88] sm:$0xff]  }
 0x2d9   :  { %3922 = vmatpush1.bf16.msra.mxu0 %v5748_v42  ;;  %4004 = vmatpush1.bf16.msra.mxu1 %v5751_v43  ;;  %v5829_v42 = vld [vmem:[%s7709_s9 + $0xd0] sm:$0xff]  }
 0x2da   :  { %3923 = vmatprep.subr.bf16.mxu0 %v5756_v44  ;;  %4005 = vmatprep.subr.bf16.mxu1 %v5759_v46  ;;  %v5830_v43 = vld [vmem:[%s7709_s9 + $0x10] sm:$0xff]   ;;  %v5832_v46 = vld [vmem:[%s7709_s9 + $0x58] sm:$0xff]  }
 0x2db   :  { %v5831_v44 = vld [vmem:[%s7709_s9 + $0x90] sm:$0xff]  }
 0x2dd   :  { %3924 = vmatpush1.bf16.msra.mxu0 %v5754_v26  ;;  %4006 = vmatpush1.bf16.msra.mxu1 %v5757_v27  ;;  %v5833_v26 = vld [vmem:[%s7709_s9 + $0xd8] sm:$0xff]  }
 0x2de   :  { %3925 = vmatprep.subr.bf16.mxu0 %v5762_v47  ;;  %4007 = vmatprep.subr.bf16.mxu1 %v5765_v48  ;;  %v5834_v27 = vld [vmem:[%s7709_s9 + $0x18] sm:$0xff]   ;;  %v5836_v48 = vld [vmem:[%s7709_s9 + $0x60] sm:$0xff]  }
 0x2df   :  { %v5835_v47 = vld [vmem:[%s7709_s9 + $0x98] sm:$0xff]  }
 0x2e1   :  { %3926 = vmatpush1.bf16.msra.mxu0 %v5760_v53  ;;  %4008 = vmatpush1.bf16.msra.mxu1 %v5763_v49  ;;  %v5837_v53 = vld [vmem:[%s7709_s9 + $0xe0] sm:$0xff]  }
 0x2e2   :  { %3927 = vmatprep.subr.bf16.mxu0 %v5768_v50  ;;  %4009 = vmatprep.subr.bf16.mxu1 %v5771_v51  ;;  %v5838_v49 = vld [vmem:[%s7709_s9 + $0x20] sm:$0xff]   ;;  %v5840_v51 = vld [vmem:[%s7709_s9 + $0x68] sm:$0xff]  }
 0x2e3   :  { %v5839_v50 = vld [vmem:[%s7709_s9 + $0xa0] sm:$0xff]  }
 0x2e5   :  { %3928 = vmatpush1.bf16.msra.mxu0 %v5766_v52  ;;  %4010 = vmatpush1.bf16.msra.mxu1 %v5769_v63  ;;  %v5841_v52 = vld [vmem:[%s7709_s9 + $0xe8] sm:$0xff]  }
 0x2e6   :  { %3929 = vmatprep.subr.bf16.mxu0 %v5774_v0  ;;  %4011 = vmatprep.subr.bf16.mxu1 %v5777_v1  ;;  %v5842_v63 = vld [vmem:[%s7709_s9 + $0x28] sm:$0xff]   ;;  %v5844_v1 = vld [vmem:[%s7709_s9 + $0x70] sm:$0xff]  }
 0x2e7   :  { %v5843_v0 = vld [vmem:[%s7709_s9 + $0xa8] sm:$0xff]  }
 0x2e9   :  { %3930 = vmatpush1.bf16.msra.mxu0 %v5772_v61  ;;  %4012 = vmatpush1.bf16.msra.mxu1 %v5775_v2  ;;  %v5845_v61 = vld [vmem:[%s7709_s9 + $0xf0] sm:$0xff]  }
 0x2ea   :  { %3931 = vmatprep.subr.bf16.mxu0 %v5780_v3  ;;  %4013 = vmatprep.subr.bf16.mxu1 %v5783_v4  ;;  %v5846_v2 = vld [vmem:[%s7709_s9 + $0x30] sm:$0xff]   ;;  %v5848_v4 = vld [vmem:[%s7709_s9 + $0x78] sm:$0xff]  }
 0x2eb   :  { %v5847_v3 = vld [vmem:[%s7709_s9 + $0xb0] sm:$0xff]  }
 0x2ed   :  { %3932 = vmatpush1.bf16.msra.mxu0 %v5778_v6  ;;  %4014 = vmatpush1.bf16.msra.mxu1 %v5781_v7  ;;  %v5849_v6 = vld [vmem:[%s7709_s9 + $0xf8] sm:$0xff]  }
 0x2ee   :  { %3933 = vmatprep.subr.bf16.mxu0 %v5786_v8  ;;  %4015 = vmatprep.subr.bf16.mxu1 %v5789_v9  ;;  %v5850_v7 = vld [vmem:[%s7709_s9 + $0x38] sm:$0xff]   ;;  %v3210_v9 = vld [vmem:[%s7711_s8] sm:$0xf] }
 0x2ef   :  { %v5851_v8 = vld [vmem:[%s7709_s9 + $0xb8] sm:$0xff]  }
 0x2f1   :  { %3934 = vmatpush1.bf16.msra.mxu0 %v5784_v11  ;;  %4016 = vmatpush1.bf16.msra.mxu1 %v5787_v12  ;;  %v3215_v11 = vrot.slane %v3210_v9, %v6979_v56  ;;  %v3223_v12 = vrot.slane %v3210_v9, %v7190_v58 }
 0x2f2   :  { %3935 = vmatprep.subr.bf16.mxu0 %v5792_v13  ;;  %4017 = vmatprep.subr.bf16.mxu1 %v5795_v15  ;;  %v3219_v13 = vrot.slane %v3210_v9, %v6987_v62  ;;  %v3227_v15 = vrot.slane %v3210_v9, %v7193_v59 }
 0x2f5   :  { %3936 = vmatpush1.bf16.msra.mxu0 %v5790_v14  ;;  %4018 = vmatpush1.bf16.msra.mxu1 %v5793_v54 }
 0x2f6   :  { %3937 = vmatprep.subr.bf16.mxu0 %v5798_v57  ;;  %4019 = vmatprep.subr.bf16.mxu1 %v5801_v18 }
 0x2f9   :  { %3938 = vmatpush1.bf16.msra.mxu0 %v5796_v20  ;;  %4020 = vmatpush1.bf16.msra.mxu1 %v5799_v19 }
 0x2fa   :  { %3939 = vmatprep.subr.bf16.mxu0 %v5804_v21  ;;  %4021 = vmatprep.subr.bf16.mxu1 %v5807_v22 }
 0x2fd   :  { %3940 = vmatpush1.bf16.msra.mxu0 %v5802_v24  ;;  %4022 = vmatpush1.bf16.msra.mxu1 %v5805_v25 }
 0x2fe   :  { %3941 = vmatprep.subr.bf16.mxu0 %v5810_v28  ;;  %4023 = vmatprep.subr.bf16.mxu1 %v5813_v5 }
 0x301   :  { %3942 = vmatpush1.bf16.msra.mxu0 %v5808_v30  ;;  %4024 = vmatpush1.bf16.msra.mxu1 %v5811_v31 }
 0x302   :  { %3943 = vmatprep.subr.bf16.mxu0 %v5816_v32  ;;  %4025 = vmatprep.subr.bf16.mxu1 %v5819_v10 }
 0x305   :  { %3944 = vmatpush1.bf16.msra.mxu0 %v5814_v33  ;;  %4026 = vmatpush1.bf16.msra.mxu1 %v5817_v34 }
 0x306   :  { %4963 = vmatprep.subr.bf16.mxu0 %v5820_v35  ;;  %4985 = vmatprep.subr.bf16.mxu1 %v5821_v60  ;;  %v4930_v60 = vld [vmem:[%s7712_s10] ss:$0 sm:$0xff] }
 0x308   :  { %3946 = vmatmul.mubr.bf16.vlgmr.msra.gmra.mrb[24].mxu0 %v3080_v16  ;;  %4028 = vmatmul.mubr.bf16.vlgmr.msra.gmra.mrb[24].mxu1 %v3080_v16 }
 0x309   :  { %4964 = vmatpush3.bf16.msra.mxu0 %v5822_v37  ;;  %4986 = vmatpush3.bf16.msra.mxu1 %v5823_v38 }
 0x30a   :  { %4965 = vmatprep.subr.bf16.mxu0 %v5824_v17  ;;  %4987 = vmatprep.subr.bf16.mxu1 %v5825_v39 }
 0x30d   :  { %4966 = vmatpush3.bf16.msra.mxu0 %v5826_v40  ;;  %4988 = vmatpush3.bf16.msra.mxu1 %v5827_v41 }
 0x30e   :  { %4967 = vmatprep.subr.bf16.mxu0 %v5828_v45  ;;  %4989 = vmatprep.subr.bf16.mxu1 %v5829_v42 }
 0x311   :  { %4968 = vmatpush3.bf16.msra.mxu0 %v5830_v43  ;;  %4990 = vmatpush3.bf16.msra.mxu1 %v5831_v44 }
 0x312   :  { %4969 = vmatprep.subr.bf16.mxu0 %v5832_v46  ;;  %4991 = vmatprep.subr.bf16.mxu1 %v5833_v26 }
 0x315   :  { %4970 = vmatpush3.bf16.msra.mxu0 %v5834_v27  ;;  %4992 = vmatpush3.bf16.msra.mxu1 %v5835_v47 }
 0x316   :  { %4971 = vmatprep.subr.bf16.mxu0 %v5836_v48  ;;  %4993 = vmatprep.subr.bf16.mxu1 %v5837_v53 }
 0x319   :  { %4972 = vmatpush3.bf16.msra.mxu0 %v5838_v49  ;;  %4994 = vmatpush3.bf16.msra.mxu1 %v5839_v50 }
 0x31a   :  { %4973 = vmatprep.subr.bf16.mxu0 %v5840_v51  ;;  %4995 = vmatprep.subr.bf16.mxu1 %v5841_v52 }
 0x31d   :  { %4974 = vmatpush3.bf16.msra.mxu0 %v5842_v63  ;;  %4996 = vmatpush3.bf16.msra.mxu1 %v5843_v0 }
 0x31e   :  { %4975 = vmatprep.subr.bf16.mxu0 %v5844_v1  ;;  %4997 = vmatprep.subr.bf16.mxu1 %v5845_v61 }
 0x321   :  { %4976 = vmatpush3.bf16.msra.mxu0 %v5846_v2  ;;  %4998 = vmatpush3.bf16.msra.mxu1 %v5847_v3 }
 0x322   :  { %4977 = vmatprep.subr.bf16.mxu0 %v5848_v4  ;;  %4999 = vmatprep.subr.bf16.mxu1 %v5849_v6 }
 0x325   :  { %4978 = vmatpush3.bf16.msra.mxu0 %v5850_v7  ;;  %5000 = vmatpush3.bf16.msra.mxu1 %v5851_v8 }
 0x3db   :  { %v3947_v14 = vpop.f32.mrb[24].mxu0  ;;  %v4029_v54 = vpop.f32.mrb[24].mxu1 }
 0x3dc   :  { %v5011_v57 = vadd.f32 %v3947_v14, %v3215_v11  ;;  %v5013_v18 = vadd.f32 %v4029_v54, %v3223_v12  ;;  %v3949_v20 = vpop.f32.mrb[25].mxu0  ;;  %v4031_v19 = vpop.f32.mrb[25].mxu1 }
 0x3dd   :  { %v5012_v21 = vadd.f32 %v3949_v20, %v3219_v13  ;;  %v5014_v22 = vadd.f32 %v4031_v19, %v3227_v15  ;;  %v3951_v23 = vpop.f32.mrb[26].mxu0  ;;  %v4033_v24 = vpop.f32.mrb[26].mxu1 }
 0x3de   :  { %vm4036_vm9 = vcmp.ge.f32.partialorder %v5011_v57, 0.0  ;;  %v4040_v25 = vmul.f32 0.2, %v5011_v57  ;;  %vm4038_vm10 = vcmp.ge.f32.partialorder %v5013_v18, 0.0  ;;  %v4042_v56 = vmul.f32 0.2, %v5013_v18 }
 0x3df   :  { %vm4037_vm11 = vcmp.ge.f32.partialorder %v5012_v21, 0.0  ;;  %v4041_v58 = vmul.f32 0.2, %v5012_v21  ;;  %vm4039_vm12 = vcmp.ge.f32.partialorder %v5014_v22, 0.0  ;;  %v4043_v62 = vmul.f32 0.2, %v5014_v22 }
 0x3e0   :  { %v4044_v28 = vsel %vm4036_vm9, %v5011_v57, %v4040_v25  ;;  %v4046_v59 = vsel %vm4038_vm10, %v5013_v18, %v4042_v56  ;;  %v3952_v5 = vpop.f32.mrb[27].mxu0  ;;  %v4034_v29 = vpop.f32.mrb[27].mxu1 }
 0x3e1   :  { %v4045_v30 = vsel %vm4037_vm11, %v5012_v21, %v4041_v58  ;;  %v4047_v31 = vsel %vm4039_vm12, %v5014_v22, %v4043_v62  ;;  %v4048_v55 = vpack.c.bf16 %v4044_v28, %v4044_v28  ;;  %v4050_v33 = vpack.c.bf16 %v4046_v59, %v4046_v59 }
 0x3e2   :  { %v4049_v32 = vpack.c.bf16 %v4045_v30, %v4045_v30  ;;  %v4051_v10 = vpack.c.bf16 %v4047_v31, %v4047_v31 }
 0x3e4   :  { %4347 = vmatprep.mubr.bf16.mxu0 %v4049_v32  ;;  %4387 = vmatprep.mubr.bf16.mxu1 %v4051_v10 }
 0x3e5   :  { %4348 = vmatmul.mubr.bf16.vlgmr.msra.gmra.mrb[28].mxu0 %v4048_v55  ;;  %4388 = vmatmul.mubr.bf16.vlgmr.msra.gmra.mrb[28].mxu1 %v4050_v33 }
 0x4b8   :  { %v4979_v34 = vpop.f32.mrb[28].mxu0  ;;  %v5001_v35 = vpop.f32.mrb[28].mxu1 }
 0x4b9   :  { %v4980_v36 = vpop.f32.mrb[29].mxu0  ;;  %v5002_v37 = vpop.f32.mrb[29].mxu1 }
 0x4ba   :  { %v4981_v38 = vadd.f32 %v4980_v36, %v4979_v34  ;;  %v5003_v16 = vadd.f32 %v5002_v37, %v5001_v35  ;;  %v4982_v17 = vpop.f32.mrb[30].mxu0  ;;  %v5004_v39 = vpop.f32.mrb[30].mxu1 }
 0x4bb   :  { %v4983_v40 = vpop.f32.mrb[31].mxu0  ;;  %v5005_v41 = vpop.f32.mrb[31].mxu1 }
 0x4bc   :  { %v4350_v45 = vadd.f32 %v4981_v38, %v4930_v60 }
 0x4be   :  { %v4390_v42 = vadd.f32 %v5003_v16, %v4350_v45 }
 0x4c0   :  { %4395 = vst [vmem:[%s7713_s11] sm:$0xff] %v4390_v42 }

</bundles_post_ra>
